<compile_context>
chip_gen: v6e
topology: v6e:2x2x1
jax: 0.10.0
libtpu: 0.0.40
codegen_flags: <defaults>
</compile_context>

<pallas_src>
import math

import jax
import jax.numpy as jnp
from jax.experimental import pallas as pl
from jax.experimental.pallas import tpu as pltpu


# ----------------------------------------------------------------------------
# Chip capability gating (v7x: 64 MiB VMEM, 2 TensorCores; v5e/v6e: 128 MiB, 1 TC)
# ----------------------------------------------------------------------------
def _tpu_caps():
    vmem = 64 << 20
    try:
        info = pltpu.get_tpu_info()
        vmem = int(getattr(info, "vmem_capacity_bytes", vmem))
    except Exception:
        pass
    vmem = max(vmem, 64 << 20)
    big_vmem = vmem >= (96 << 20)          # v5e / v6e (128 MiB VMEM)
    multi_tc = not big_vmem                # treat 64 MiB chips as v7x (2 TCs)
    return vmem, big_vmem, multi_tc


VMEM_CAP, BIG_VMEM, MULTI_TC = _tpu_caps()
TK_CAP = 4096 if BIG_VMEM else 2048        # K-tile cap (bigger tiles on 128 MiB chips)
TN_CAP = 2048 if BIG_VMEM else 1024        # N-tile cap (bounds f32 out / dequant block)
TM_CAP = 256                               # M tile: multiple of 128 (fills v5e's 128-row MXU)


# ----------------------------------------------------------------------------
# Helpers
# ----------------------------------------------------------------------------
def _round_up(x, m):
    return (x + m - 1) // m * m


def _pick_tk(Kp, cap):
    """Largest tk = 128*d (d divides Kp//128) not exceeding cap."""
    nblk = Kp // 128
    d_best = 1
    for d in range(1, nblk + 1):
        if nblk % d == 0 and 128 * d <= cap:
            d_best = d
    return 128 * d_best


# ----------------------------------------------------------------------------
# Parameter preparation: pad K/N to tile multiples once, quantise weight to
# int8 (per-output-column scale) or cast to bf16, and merge
# bias / BN-scale / BN-shift / weight-scale into one (4, NP) f32 aux tensor.
# ----------------------------------------------------------------------------
def prep_linear(w, b, scale=None, shift=None, quantize=True):
    w = jnp.asarray(w, jnp.float32)
    b = jnp.asarray(b, jnp.float32)
    K, N = w.shape

    Kp = _round_up(K, 128)
    tk = _pick_tk(Kp, TK_CAP)

    NP0 = _round_up(N, 128)
    if NP0 <= TN_CAP:
        tn, NP = NP0, NP0
    else:
        tn = TN_CAP
        NP = _round_up(NP0, tn)

    if quantize:
        absmax = jnp.max(jnp.abs(w), axis=0)
        wscale = jnp.maximum(absmax, 1e-8) / 127.0
        wq = jnp.clip(jnp.round(w / wscale[None, :]), -127.0, 127.0).astype(jnp.int8)
        wp = jnp.zeros((Kp, NP), jnp.int8).at[:K, :N].set(wq)
    else:
        wscale = jnp.ones((N,), jnp.float32)
        wp = jnp.zeros((Kp, NP), jnp.bfloat16).at[:K, :N].set(w.astype(jnp.bfloat16))

    aux = jnp.zeros((4, NP), jnp.float32)
    aux = aux.at[0, :N].set(b)
    aux = aux.at[1, :N].set(jnp.ones((N,), jnp.float32) if scale is None
                            else jnp.asarray(scale, jnp.float32))
    aux = aux.at[2, :N].set(jnp.zeros((N,), jnp.float32) if shift is None
                            else jnp.asarray(shift, jnp.float32))
    aux = aux.at[3, :N].set(wscale)
    return {"w": wp, "aux": aux, "K": K, "N": N, "tk": tk, "tn": tn}


# ----------------------------------------------------------------------------
# Pallas matmul kernel: out = act((x @ W) * wscale + b) * bn_scale + bn_shift
#   - bf16 MXU operands (int8 weights dequantised in-kernel), f32 accumulation
#   - grid = (M tiles "parallel", N tiles "parallel", K tiles "arbitrary")
# ----------------------------------------------------------------------------
def linear_pallas(x, prep, act=None, out_dtype=jnp.float32):
    w, aux, K, N = prep["w"], prep["aux"], prep["K"], prep["N"]
    tk, tn = prep["tk"], prep["tn"]
    Kp, NPad = w.shape
    nk = Kp // tk
    nn = NPad // tn

    M = x.shape[0]
    if M <= TM_CAP:
        tm = _round_up(max(M, 1), 16)      # bf16 sublane packing
        Mp = tm
    else:
        tm = TM_CAP
        Mp = _round_up(M, TM_CAP)
    nm = Mp // tm

    # v7x only: guarantee >=2 parallel tiles so both TensorCores get work.
    if MULTI_TC and nm * nn == 1 and tn % 256 == 0:
        tn //= 2
        nn = 2

    xb = x.astype(jnp.bfloat16)
    if (Mp, Kp) != (M, K):
        xp = jnp.zeros((Mp, Kp), jnp.bfloat16).at[:M, :K].set(xb)
    else:
        xp = xb

    def epilogue(acc, aux_ref):
        y = acc * aux_ref[3:4, :] + aux_ref[0:1, :]      # f32 epilogue (v5e-safe)
        if act == "relu":
            y = jnp.maximum(y, 0.0)
        elif act == "sigmoid":
            y = jax.nn.sigmoid(y)
        return y * aux_ref[1:2, :] + aux_ref[2:3, :]

    if nk == 1:
        def kern(x_ref, w_ref, aux_ref, o_ref):
            acc = jnp.dot(x_ref[...], w_ref[...].astype(jnp.bfloat16),
                          preferred_element_type=jnp.float32)
            o_ref[...] = epilogue(acc, aux_ref).astype(o_ref.dtype)
        scratch = []
    else:
        def kern(x_ref, w_ref, aux_ref, o_ref, acc_ref):
            k = pl.program_id(2)

            @pl.when(k == 0)
            def _():
                acc_ref[...] = jnp.zeros_like(acc_ref)

            acc_ref[...] += jnp.dot(x_ref[...], w_ref[...].astype(jnp.bfloat16),
                                    preferred_element_type=jnp.float32)

            @pl.when(k == nk - 1)
            def _():
                o_ref[...] = epilogue(acc_ref[...], aux_ref).astype(o_ref.dtype)
        scratch = [pltpu.VMEM((tm, tn), jnp.float32)]

    w_bytes = 1 if w.dtype == jnp.int8 else 2
    o_bytes = 2 if out_dtype == jnp.bfloat16 else 4
    vmem_need = (2 * tm * tk * 2            # double-buffered x blocks (bf16)
                 + 2 * tk * tn * w_bytes    # double-buffered weight blocks
                 + tk * tn * 2              # in-kernel bf16 dequant intermediate
                 + 2 * 4 * tn * 4           # aux blocks
                 + 2 * tm * tn * o_bytes    # output blocks
                 + (tm * tn * 4 if nk > 1 else 0)   # f32 accumulator scratch
                 + (4 << 20))
    vmem_limit = int(min(max(vmem_need, 16 << 20), int(0.6 * VMEM_CAP)))

    out = pl.pallas_call(
        kern,
        out_shape=jax.ShapeDtypeStruct((Mp, NPad), out_dtype),
        grid=(nm, nn, nk),
        in_specs=[
            pl.BlockSpec((tm, tk), lambda m, j, k: (m, k)),
            pl.BlockSpec((tk, tn), lambda m, j, k: (k, j)),
            pl.BlockSpec((4, tn), lambda m, j, k: (0, j)),
        ],
        out_specs=pl.BlockSpec((tm, tn), lambda m, j, k: (m, j)),
        scratch_shapes=scratch,
        compiler_params=pltpu.CompilerParams(
            dimension_semantics=("parallel", "parallel", "arbitrary"),
            vmem_limit_bytes=vmem_limit),
    )(xp, w, aux)
    return out[:M, :N]


# ----------------------------------------------------------------------------
# Pallas attention kernel: one grid step per head ("parallel" => v7x TCs),
# bf16 MXU operands, head dim padded to 256 lanes, f32 softmax.
# ----------------------------------------------------------------------------
def attention_heads(qh, kh, vh, bias, scale):
    """qh,kh,vh: (H,N,Dh), bias: (N,N) additive mask -> (H,N,Dh) f32."""
    H, N, Dh = qh.shape
    Dhp = _round_up(Dh, 128)
    if Dhp != Dh:
        pad = ((0, 0), (0, 0), (0, Dhp - Dh))
        qh, kh, vh = jnp.pad(qh, pad), jnp.pad(kh, pad), jnp.pad(vh, pad)
    qh = qh.astype(jnp.bfloat16)
    kh = kh.astype(jnp.bfloat16)
    vh = vh.astype(jnp.bfloat16)

    # TODO(synk): for large Npair add a KV-tile grid axis with online softmax;
    # at Npair ~ O(10) the whole head fits one block.
    def kern(q_ref, k_ref, v_ref, b_ref, o_ref):
        q = q_ref[0]
        k = k_ref[0]
        v = v_ref[0]
        s = jax.lax.dot_general(q, k, (((1,), (1,)), ((), ())),
                                preferred_element_type=jnp.float32)
        s = s * scale + b_ref[...]
        s = s - jnp.max(s, axis=-1, keepdims=True)
        p = jnp.exp(s)
        denom = jnp.sum(p, axis=-1, keepdims=True)
        p = p * pl.reciprocal(denom, approx=True)
        o_ref[0] = jnp.dot(p.astype(jnp.bfloat16), v,
                           preferred_element_type=jnp.float32)

    out = pl.pallas_call(
        kern,
        out_shape=jax.ShapeDtypeStruct((H, N, Dhp), jnp.float32),
        grid=(H,),
        in_specs=[
            pl.BlockSpec((1, N, Dhp), lambda h: (h, 0, 0)),
            pl.BlockSpec((1, N, Dhp), lambda h: (h, 0, 0)),
            pl.BlockSpec((1, N, Dhp), lambda h: (h, 0, 0)),
            pl.BlockSpec((N, N), lambda h: (0, 0)),
        ],
        out_specs=pl.BlockSpec((1, N, Dhp), lambda h: (h, 0, 0)),
        compiler_params=pltpu.CompilerParams(
            dimension_semantics=("parallel",)),
    )(qh, kh, vh, bias)
    return out[:, :, :Dh]


# ----------------------------------------------------------------------------
# Conv / pooling helpers (im2col glue + Pallas matmul hot path)
# ----------------------------------------------------------------------------
def conv2d_pallas(x_nchw, prep, kh, kw, stride, pad, act=None):
    # TODO(synk): fold the im2col into the kernel (grid over kh*kw with
    # accumulation) if spatial-mask resolution / batch grows.
    N, C, H, W = x_nchw.shape
    O = prep["N"]
    xp = jnp.pad(x_nchw, ((0, 0), (0, 0), (pad, pad), (pad, pad)))
    Ho = (H + 2 * pad - kh) // stride + 1
    Wo = (W + 2 * pad - kw) // stride + 1
    cols = []
    for i in range(kh):
        for j in range(kw):
            cols.append(xp[:, :, i:i + stride * Ho:stride, j:j + stride * Wo:stride])
    patches = jnp.stack(cols, axis=2)                       # (N, C, kh*kw, Ho, Wo)
    patches = patches.transpose(0, 3, 4, 1, 2).reshape(N * Ho * Wo, C * kh * kw)
    y = linear_pallas(patches, prep, act=act)
    return y.reshape(N, Ho, Wo, O).transpose(0, 3, 1, 2)    # back to NCHW


def maxpool2d(x_nchw, k, s, p):
    return jax.lax.reduce_window(
        x_nchw, -jnp.inf, jax.lax.max,
        (1, 1, k, k), (1, 1, s, s),
        ((0, 0), (0, 0), (p, p), (p, p)))


def layer_norm(x, g, b, eps=1e-5):
    m = jnp.mean(x, -1, keepdims=True)
    v = jnp.mean((x - m) ** 2, -1, keepdims=True)
    return (x - m) * jax.lax.rsqrt(v + eps) * g + b


# ----------------------------------------------------------------------------
# Transformer (glocal_transformer, mode='latter') — eval semantics
# ----------------------------------------------------------------------------
def _split_heads(x, nhead):
    N, D = x.shape
    Dh = D // nhead
    return x.reshape(N, nhead, Dh).transpose(1, 0, 2)


def _attn(q, k, v, bias, nhead, D):
    N = q.shape[0]
    Dh = D // nhead
    o = attention_heads(_split_heads(q, nhead), _split_heads(k, nhead),
                        _split_heads(v, nhead), bias, float(1.0 / math.sqrt(Dh)))
    return o.transpose(1, 0, 2).reshape(N, D)


def enc_layer(x, p, bias, nhead, D):
    qkv = linear_pallas(x, p["qkv"], out_dtype=jnp.bfloat16)   # fused Q|K|V
    q, k, v = qkv[:, :D], qkv[:, D:2 * D], qkv[:, 2 * D:3 * D]
    a = linear_pallas(_attn(q, k, v, bias, nhead, D), p["out"])
    x = layer_norm(x + a, p["ln1_g"], p["ln1_b"])
    f = linear_pallas(x, p["ff1"], act="relu", out_dtype=jnp.bfloat16)
    f = linear_pallas(f, p["ff2"])
    return layer_norm(x + f, p["ln2_g"], p["ln2_b"])


def dec_layer(x, pos, p, bias, nhead, D):
    xq = x + pos                                            # position added to q/k
    qk = linear_pallas(xq, p["qk"], out_dtype=jnp.bfloat16)   # fused Q|K
    q, k = qk[:, :D], qk[:, D:2 * D]
    v = linear_pallas(x, p["v"], out_dtype=jnp.bfloat16)
    a = linear_pallas(_attn(q, k, v, bias, nhead, D), p["out"])
    x = layer_norm(x + a, p["ln1_g"], p["ln1_b"])
    f = linear_pallas(x, p["ff1"], act="relu", out_dtype=jnp.bfloat16)
    f = linear_pallas(f, p["ff2"])
    return layer_norm(x + f, p["ln2_g"], p["ln2_b"])


def glocal_transformer(feats, im_idx, tparams, nhead, enc_n, dec_n, D):
    # TODO(synk): the original lib/transformer.py packs pairs into padded
    # [l, b, d] frame batches and a 2-frame sliding-window decoder; here the
    # same locality is expressed with additive attention masks on the flat
    # pair sequence (frame-local for the encoder, {prev,current}-frame window
    # for the 'latter'-mode decoder). Assumes contiguous zero-based im_idx.
    fi = im_idx.astype(jnp.float32)
    qf = fi[:, None]
    kf = fi[None, :]
    local_bias = jnp.where(qf == kf, 0.0, -1e9).astype(jnp.float32)
    win_ok = (kf == qf) | jnp.where(qf == 0, kf == 1.0, kf == qf - 1.0)
    global_bias = jnp.where(win_ok, 0.0, -1e9).astype(jnp.float32)

    x = feats
    for l in range(enc_n):
        x = enc_layer(x, tparams["enc"][l], local_bias, nhead, D)
    pe = tparams["pos_embed"]
    pos = jnp.where((fi == 0)[:, None], pe[0][None, :], pe[1][None, :])
    for l in range(dec_n):
        x = dec_layer(x, pos, tparams["dec"][l], global_bias, nhead, D)
    return x


# ----------------------------------------------------------------------------
# STTran forward (mode='predcls', eval semantics)
# NOTE(perf): M of every linear scales with the number of human-object pairs
# in the call; batching several clips per forward (M >= 256) moves all linears
# off the weight-DMA wall — the M-tiled kernel above handles any M.
# ----------------------------------------------------------------------------
def sttran_forward(params, entry, nhead=8, enc_n=1, dec_n=1,
                   att_cls=3, spa_cls=6, con_cls=17, embed_dim=1936):
    # ObjectClassifier in 'predcls' mode: pred_labels = labels (no compute).
    # TODO(synk): sgdet/sgcls ObjectClassifier branches (NMS, ROIAlign,
    # draw_union_boxes, per-class dedup) are data-dependent host-style code
    # with no clean Pallas equivalent and are not implemented here.
    pred_labels = entry["labels"]
    pair_idx = entry["pair_idx"]
    feats = entry["features"]
    Npair = pair_idx.shape[0]

    # subj_fc + obj_fc fused: gather both halves along M, weights concatenated along N.
    so_in = jnp.concatenate([feats[pair_idx[:, 0]], feats[pair_idx[:, 1]]], axis=0)
    so = linear_pallas(so_in, params["so_fc"])              # (2*Np, 1024)
    subj_rep = so[:Npair, :512]
    obj_rep = so[Npair:, 512:]

    # union_func1: 1x1 conv over NCHW union_feat == per-pixel matmul over channels
    uf = entry["union_feat"]                                # (Np, 1024, 7, 7) NCHW
    uf2 = uf.transpose(0, 2, 3, 1).reshape(Npair * 49, 1024)
    u = linear_pallas(uf2, params["union"])
    u = u.reshape(Npair, 7, 7, 256).transpose(0, 3, 1, 2)

    # self.conv: Conv(2->128,7,s2,p3) -> ReLU -> BN -> MaxPool(3,2,1)
    #            -> Conv(128->256,3,s1,p1) -> ReLU -> BN    (eval-mode BN folded)
    sm = entry["spatial_masks"]                             # (Np, 2, 27, 27) NCHW
    c = conv2d_pallas(sm, params["conv1"], 7, 7, 2, 3, act="relu")
    c = maxpool2d(c, 3, 2, 1)
    c = conv2d_pallas(c, params["conv2"], 3, 3, 1, 1, act="relu")

    vr = u + c                                              # (Np, 256, 7, 7) NCHW
    vr = linear_pallas(vr.reshape(Npair, 256 * 7 * 7), params["vr_fc"])

    x_visual = jnp.concatenate([subj_rep, obj_rep, vr], axis=1)        # (Np, 1536)

    subj_emb = params["obj_embed"][pred_labels[pair_idx[:, 0]]]
    obj_emb = params["obj_embed2"][pred_labels[pair_idx[:, 1]]]
    x_semantic = jnp.concatenate([subj_emb, obj_emb], axis=1)          # (Np, 400)

    rel_features = jnp.concatenate([x_visual, x_semantic], axis=1)     # (Np, 1936)

    go = glocal_transformer(rel_features, entry["im_idx"],
                            params["transformer"], nhead, enc_n, dec_n, embed_dim)

    # a / s / c heads fused into one matmul (N = 3+6+17 = 26), sliced afterwards.
    heads = linear_pallas(go, params["heads"])              # (Np, 26)
    att = heads[:, :att_cls]
    spa = jax.nn.sigmoid(heads[:, att_cls:att_cls + spa_cls])
    con = jax.nn.sigmoid(heads[:, att_cls + spa_cls:att_cls + spa_cls + con_cls])

    out = dict(entry)
    out["pred_labels"] = pred_labels
    out["attention_distribution"] = att
    out["spatial_distribution"] = spa
    out["contacting_distribution"] = con
    out["global_output"] = go
    return out


# ----------------------------------------------------------------------------
# Deterministic raw parameter construction (matches the PyTorch module)
# ----------------------------------------------------------------------------
def make_params(key, num_obj_classes=11, att_cls=3, spa_cls=6, con_cls=17,
                embed_dim=1936, nhead=8, ffn=2048, enc_n=1, dec_n=1):
    keys = iter(jax.random.split(key, 256))

    def w(shape, s=0.02):
        return jax.random.normal(next(keys), shape, jnp.float32) * s

    def z(n):
        return jnp.zeros((n,), jnp.float32)

    def tlayer():
        return {
            "wq": w((embed_dim, embed_dim)), "bq": z(embed_dim),
            "wk": w((embed_dim, embed_dim)), "bk": z(embed_dim),
            "wv": w((embed_dim, embed_dim)), "bv": z(embed_dim),
            "wo": w((embed_dim, embed_dim)), "bo": z(embed_dim),
            "ln1_g": jnp.ones((embed_dim,), jnp.float32), "ln1_b": z(embed_dim),
            "w1": w((embed_dim, ffn)), "b1": z(ffn),
            "w2": w((ffn, embed_dim)), "b2": z(embed_dim),
            "ln2_g": jnp.ones((embed_dim,), jnp.float32), "ln2_b": z(embed_dim),
        }

    return {
        "subj_fc_w": w((2048, 512)), "subj_fc_b": z(512),
        "obj_fc_w": w((2048, 512)), "obj_fc_b": z(512),
        "vr_fc_w": w((256 * 7 * 7, 512)), "vr_fc_b": z(512),
        "union_w": w((1024, 256)), "union_b": z(256),
        "conv1_w": w((128, 2, 7, 7)), "conv1_b": z(128),
        "bn1": (jnp.ones((128,), jnp.float32), z(128), z(128),
                jnp.ones((128,), jnp.float32), 1e-5),
        "conv2_w": w((256, 128, 3, 3)), "conv2_b": z(256),
        "bn2": (jnp.ones((256,), jnp.float32), z(256), z(256),
                jnp.ones((256,), jnp.float32), 1e-5),
        "obj_embed": w((num_obj_classes, 200), 0.1),
        "obj_embed2": w((num_obj_classes, 200), 0.1),
        "transformer": {
            "enc": [tlayer() for _ in range(enc_n)],
            "dec": [tlayer() for _ in range(dec_n)],
            "pos_embed": w((2, embed_dim), 0.1),
        },
        "a_w": w((embed_dim, att_cls)), "a_b": z(att_cls),
        "s_w": w((embed_dim, spa_cls)), "s_b": z(spa_cls),
        "c_w": w((embed_dim, con_cls)), "c_b": z(con_cls),
    }


# ----------------------------------------------------------------------------
# One-time inference parameter preparation (fusion, padding, int8/bf16 cast)
# ----------------------------------------------------------------------------
def prep_params(raw):
    # BN(eval) folded into epilogue scale/shift (Conv -> ReLU -> BN order kept).
    g1, b1, m1, v1, e1 = raw["bn1"]
    sc1 = g1 / jnp.sqrt(v1 + e1)
    sh1 = b1 - m1 * sc1
    g2, b2, m2, v2, e2 = raw["bn2"]
    sc2 = g2 / jnp.sqrt(v2 + e2)
    sh2 = b2 - m2 * sc2

    def enc_prep(l):
        return {
            "qkv": prep_linear(jnp.concatenate([l["wq"], l["wk"], l["wv"]], axis=1),
                               jnp.concatenate([l["bq"], l["bk"], l["bv"]])),
            "out": prep_linear(l["wo"], l["bo"]),
            "ff1": prep_linear(l["w1"], l["b1"]),
            "ff2": prep_linear(l["w2"], l["b2"]),
            "ln1_g": l["ln1_g"], "ln1_b": l["ln1_b"],
            "ln2_g": l["ln2_g"], "ln2_b": l["ln2_b"],
        }

    def dec_prep(l):
        return {
            "qk": prep_linear(jnp.concatenate([l["wq"], l["wk"]], axis=1),
                              jnp.concatenate([l["bq"], l["bk"]])),
            "v": prep_linear(l["wv"], l["bv"]),
            "out": prep_linear(l["wo"], l["bo"]),
            "ff1": prep_linear(l["w1"], l["b1"]),
            "ff2": prep_linear(l["w2"], l["b2"]),
            "ln1_g": l["ln1_g"], "ln1_b": l["ln1_b"],
            "ln2_g": l["ln2_g"], "ln2_b": l["ln2_b"],
        }

    return {
        "so_fc": prep_linear(
            jnp.concatenate([raw["subj_fc_w"], raw["obj_fc_w"]], axis=1),
            jnp.concatenate([raw["subj_fc_b"], raw["obj_fc_b"]])),
        "vr_fc": prep_linear(raw["vr_fc_w"], raw["vr_fc_b"]),
        "union": prep_linear(raw["union_w"], raw["union_b"]),
        "conv1": prep_linear(raw["conv1_w"].reshape(128, -1).T, raw["conv1_b"],
                             scale=sc1, shift=sh1, quantize=False),
        "conv2": prep_linear(raw["conv2_w"].reshape(256, -1).T, raw["conv2_b"],
                             scale=sc2, shift=sh2),
        "obj_embed": raw["obj_embed"],
        "obj_embed2": raw["obj_embed2"],
        "transformer": {
            "enc": [enc_prep(l) for l in raw["transformer"]["enc"]],
            "dec": [dec_prep(l) for l in raw["transformer"]["dec"]],
            "pos_embed": raw["transformer"]["pos_embed"],
        },
        "heads": prep_linear(
            jnp.concatenate([raw["a_w"], raw["s_w"], raw["c_w"]], axis=1),
            jnp.concatenate([raw["a_b"], raw["s_b"], raw["c_b"]]),
            quantize=False),
    }


# ----------------------------------------------------------------------------
if __name__ == "__main__":
    key = jax.random.PRNGKey(0)
    kp, k1, k2, k3, k4, k5 = jax.random.split(key, 6)

    NUM_OBJ_CLASSES = 11
    N_OBJ = 12           # detected boxes / features
    N_PAIR = 8           # human-object pairs

    raw_params = make_params(kp, num_obj_classes=NUM_OBJ_CLASSES,
                             att_cls=3, spa_cls=6, con_cls=17,
                             enc_n=1, dec_n=1)
    params = prep_params(raw_params)

    entry = {
        "features": jax.random.normal(k1, (N_OBJ, 2048), jnp.float32) * 0.1,
        "labels": jax.random.randint(k2, (N_OBJ,), 0, NUM_OBJ_CLASSES),
        "pair_idx": jax.random.randint(k3, (N_PAIR, 2), 0, N_OBJ),
        "im_idx": jnp.array([0, 0, 0, 1, 1, 1, 2, 2], jnp.float32),
        "union_feat": jax.random.normal(k4, (N_PAIR, 1024, 7, 7), jnp.float32) * 0.1,
        "spatial_masks": (jax.random.bernoulli(k5, 0.3, (N_PAIR, 2, 27, 27))
                          .astype(jnp.float32) - 0.5),
    }

    out = sttran_forward(params, entry, nhead=8, enc_n=1, dec_n=1)
    jax.block_until_ready(out["attention_distribution"])
    jax.block_until_ready(out["spatial_distribution"])
    jax.block_until_ready(out["contacting_distribution"])
    jax.block_until_ready(out["global_output"])

    assert out["attention_distribution"].shape == (N_PAIR, 3)
    assert out["spatial_distribution"].shape == (N_PAIR, 6)
    assert out["contacting_distribution"].shape == (N_PAIR, 17)
    assert out["global_output"].shape == (N_PAIR, 1936)
    assert bool(jnp.all(jnp.isfinite(out["attention_distribution"])))
    assert bool(jnp.all(jnp.isfinite(out["global_output"])))
    print("KERNEL_OK")
</pallas_src>

<mosaic_0001>
module attributes {stable_mosaic.version = 11 : i64} {
  func.func @kern(%arg0: i32, %arg1: i32, %arg2: i32, %arg3: memref<16x2048xbf16, #tpu.memory_space<vmem>>, %arg4: memref<2048x512xi8, #tpu.memory_space<vmem>>, %arg5: memref<4x512xf32, #tpu.memory_space<vmem>>, %arg6: memref<16x512xf32, #tpu.memory_space<vmem>>) attributes {dimension_semantics = [#tpu.dimension_semantics<parallel>, #tpu.dimension_semantics<parallel>, #tpu.dimension_semantics<arbitrary>], iteration_bounds = array<i64: 1, 2, 1>, scalar_prefetch = 0 : i64, scratch_operands = 0 : i64, tpu.core_type = #tpu.core_type<tc>, window_params = [{transform_indices = @transform_0, window_bounds = array<i64: 16, 2048>}, {transform_indices = @transform_1, window_bounds = array<i64: 2048, 512>}, {transform_indices = @transform_2, window_bounds = array<i64: 4, 512>}, {transform_indices = @transform_3, window_bounds = array<i64: 16, 512>}]} {
    %c0 = arith.constant 0 : index
    %c0_0 = arith.constant 0 : index
    %0 = vector.load %arg3[%c0, %c0_0] : memref<16x2048xbf16, #tpu.memory_space<vmem>>, vector<16x2048xbf16>
    %c0_1 = arith.constant 0 : index
    %c0_2 = arith.constant 0 : index
    %1 = vector.load %arg4[%c0_1, %c0_2] : memref<2048x512xi8, #tpu.memory_space<vmem>>, vector<2048x512xi8>
    %2 = arith.sitofp %1 : vector<2048x512xi8> to vector<2048x512xbf16>
    %cst = arith.constant dense<0.000000e+00> : vector<16x512xf32>
    %3 = tpu.matmul %0, %2, %cst {dimension_numbers = #tpu.dot_dimension_numbers<[1], [0], [0], [1], [0, 0, 1, 1], [], []>} : vector<16x2048xbf16>, vector<2048x512xbf16>, vector<16x512xf32> -> vector<16x512xf32>
    %c3 = arith.constant 3 : index
    %c0_3 = arith.constant 0 : index
    %4 = vector.load %arg5[%c3, %c0_3] : memref<4x512xf32, #tpu.memory_space<vmem>>, vector<1x512xf32>
    %5 = vector.broadcast %4 : vector<1x512xf32> to vector<16x512xf32>
    %6 = arith.mulf %3, %5 : vector<16x512xf32>
    %c0_4 = arith.constant 0 : index
    %c0_5 = arith.constant 0 : index
    %7 = vector.load %arg5[%c0_4, %c0_5] : memref<4x512xf32, #tpu.memory_space<vmem>>, vector<1x512xf32>
    %8 = vector.broadcast %7 : vector<1x512xf32> to vector<16x512xf32>
    %9 = arith.addf %6, %8 : vector<16x512xf32>
    %c1 = arith.constant 1 : index
    %c0_6 = arith.constant 0 : index
    %10 = vector.load %arg5[%c1, %c0_6] : memref<4x512xf32, #tpu.memory_space<vmem>>, vector<1x512xf32>
    %11 = vector.broadcast %10 : vector<1x512xf32> to vector<16x512xf32>
    %12 = arith.mulf %9, %11 : vector<16x512xf32>
    %c2 = arith.constant 2 : index
    %c0_7 = arith.constant 0 : index
    %13 = vector.load %arg5[%c2, %c0_7] : memref<4x512xf32, #tpu.memory_space<vmem>>, vector<1x512xf32>
    %14 = vector.broadcast %13 : vector<1x512xf32> to vector<16x512xf32>
    %15 = arith.addf %12, %14 : vector<16x512xf32>
    %c0_8 = arith.constant 0 : index
    %c0_9 = arith.constant 0 : index
    %16 = vector.load %arg6[%c0_8, %c0_9] : memref<16x512xf32, #tpu.memory_space<vmem>>, vector<16x512xf32>
    tpu.vector_store %arg6[%c0_8, %c0_9], %15 {strides = array<i32>} : memref<16x512xf32, #tpu.memory_space<vmem>>, vector<16x512xf32>,
    return
  }
  func.func @transform_0(%arg0: i32, %arg1: i32, %arg2: i32) -> (i32, i32) {
    %c0_i32 = arith.constant 0 : i32
    return %arg0, %arg2 : i32, i32
  }
  func.func @transform_1(%arg0: i32, %arg1: i32, %arg2: i32) -> (i32, i32) {
    %c0_i32 = arith.constant 0 : i32
    return %arg2, %arg1 : i32, i32
  }
  func.func @transform_2(%arg0: i32, %arg1: i32, %arg2: i32) -> (i32, i32) {
    %c0_i32 = arith.constant 0 : i32
    %c0_i32_0 = arith.constant 0 : i32
    return %c0_i32, %arg1 : i32, i32
  }
  func.func @transform_3(%arg0: i32, %arg1: i32, %arg2: i32) -> (i32, i32) {
    %c0_i32 = arith.constant 0 : i32
    return %arg0, %arg1 : i32, i32
  }
}

</mosaic_0001>

<bundles_post_ra>
// kernel: tpu_custom_call.1
= control target key start
LH: loop header
LB: loop body
LE: loop exit
PB: predicated region body
PF: predicated region fallthrough
CT: control target
= control target key end

     0   :  { %8 = vsyncpa [#allocation3], 0  ;;  %s3144_s0 = inlined_call_operand.hbm [shape: bf16[16,2048], index: 0, kind: input, shape index: {}]   ;;  %s3145_s1 = inlined_call_operand.hbm [shape: s8[2048,1024], index: 1, kind: input, shape index: {}]   ;;  %s3146_s2 = inlined_call_operand.hbm [shape: f32[4,1024], index: 2, kind: input, shape index: {}]   ;;  %s3147_s3 = inlined_call_operand.hbm [shape: f32[16,1024], index: 3, kind: output, shape index: {}]  }
   0x1   :  { %9 = vsyncpa [#allocation6], 0 }
   0x2   :  { %11 = vsyncpa [#allocation6 + $0x1], 0 }
   0x3   :  { %12 = vsyncpa [#allocation4], 0 }
   0x4   :  { %14 = vsyncpa [#allocation4 + $0x1], 0  ;;  %s2439_s12 = smov 0   ;;  %s2441_s13 = smov 0  }
   0x5   :  { %s2443_s14 = smov 0   ;;  %s2445_s15 = smov 0  }
   0x6   :  { %s2447_s16 = smov 0   ;;  %s2449_s17 = smov 0  }
   0x7 LB: > { %s35_s18 = sadd.s32 1, %s2402_s16  ;;  %s76_s19 = sadd.s32 1, %s2394_s14  ;;  %s2406_s17 = sphi %s2449_s17, %s20_s17   ;;  %s2402_s16 = sphi %s2447_s16, %s3165_s16   ;;  %s2398_s15 = sphi %s2445_s15, %s3164_s15   ;;  %s2394_s14 = sphi %s2443_s14, %s3163_s14   ;;  %s2390_s13 = sphi %s2441_s13, %s3162_s13   ;;  %s2386_s12 = sphi %s2439_s12, %s3161_s12  }
   0x8   : > { %p37_p0 = scmp.ge.s32.totalorder %s35_s18, 2  ;;  %p83_p1 = scmp.ne.s32.totalorder %s2394_s14, %s2390_s13 }
   0x9   : > { %p84_p2 = scmp.eq.s32.totalorder %s2406_s17, 0  ;;  %p2181_p5 = scmp.lt.s32.totalorder %s2406_s17, 2 }
   0xa   : > { %s3167_s18 = smov (%p37_p0, %s35_s18), 0  ;;  %s186_s22 = sand.u32 1, %s2406_s17  }
   0xb   : > { %p2479_p3 = por %p84_p2, %p83_p1  ;;  %s72_s21 = ssub.s32 %s2402_s16, %s3167_s18 }
   0xc   : > { %p74_p6 = scmp.eq.s32.totalorder %s72_s21, 0  ;;  %s188_s23 = sand.u32 1, %s2394_s14  }
   0xd   : > { %s2117_s25 = sshll.u32 %s188_s23, 11  ;;  %s2152_s26 = sshll.u32 %s2402_s16, 9 }
   0xe   : > { %s2490_s24 = scalar_select %p74_p6, %s2394_s14, %s76_s19  }
   0xf   : > { %s199_s29 = scalar_lea.hbm %s3145_s1, %s2152_s26  ;;  %s190_s30 = scalar_lea.vmem [#allocation5], %s2117_s25 }
  0x10   : > { %s200_s4 = sshll.u32 %s190_s30, 4  ;;  %p2500_p7 = pnand %p2181_p5, %p2479_p3  ;;  %s201_s4 = int_to_ptr.vmem [resolvable:$true] %s200_s4 }
  0x11   : > { %s2504_s6 = scalar_lea.sflag [#allocation6], %s186_s22  ;;  %s2253_s7 = scalar_lea.vmem %s201_s4, 32768 }
  0x12   : > { %p3148_p8 = pneg %p2500_p7  ;;  %p2254_p9 = scmp.ne.s32.totalorder %s201_s4, %s2253_s7 }
  0x13   : > { %s2408_s8 = smov [#allocation5]  }
  0x14   : > { %p2256_p10 = pnand %p2254_p9, %p3148_p8  ;;  %s2258_s9 = sshll.u32 %s2408_s8, 4  ;;  %s2259_s9 = int_to_ptr.vmem [resolvable:$false] %s2258_s9 }
  0x15   : > { %s2260_s10 = scalar_lea.vmem %s2259_s9, 65536  ;;  %p2261_p12 = scmp.lt.s32.totalorder %s201_s4, %s2259_s9 }
  0x16   : > { %p2257_p11 = pneg %p2256_p10  ;;  %p2262_p13 = scmp.lt.s32.totalorder %s2260_s10, %s2253_s7 }
  0x18   : > { %p2263_p0 = por %p2262_p13, %p2261_p12 }
  0x1a   : > { %p2264_p2 = pnand %p2263_p0, %p2257_p11 }
  0x1c   : > { %2267 = shalt.err (!%p2264_p2)
}
  0x1d   : > { %s2409_s11 = smov 1024   ;;  %s2410_s19 = smov 512  }
  0x1e   : > { %s2411_s20 = smov 32   ;;  %s2516_s21 = sadd.s32 4294967295, %s2406_s17  }
  0x1f   : > { %2172 = dma.hbm_to_vmem [thread:$0]  (!%p2500_p7), %s199_s29, 32768, %s201_s4, %s2504_s6, %s2409_s11, %s2410_s19, %s2411_s20  }
  0x20   : > { %s2113_s22 = sadd.s32 4294967294, %s2406_s17   ;;  %p89_p3 = scmp.ne.s32.totalorder %s2390_s13, %s2386_s12 }
  0x21   : > { %p90_p5 = scmp.eq.s32.totalorder %s2516_s21, 0  ;;  %p141_p6 = scmp.eq.s32.totalorder %s2516_s21, 1 }
  0x22   : > { %p147_p9 = scmp.eq.s32.totalorder %s2113_s22, 1  ;;  %p2114_p11 = scmp.ge.s32.totalorder %s2406_s17, 1 }
  0x23   : > { %p2525_p10 = por %p90_p5, %p89_p3  ;;  %p2533_p12 = por %p141_p6, %p83_p1 }
  0x24   : > { %p2537_p13 = por %p147_p9, %p89_p3  ;;  %p154_p0 = scmp.lt.s32.totalorder %s2406_s17, 3 }
  0x25   : > { %s3153_s26 = scalar_select %p2533_p12, 1, 0 }
  0x26   : > { %s3154_s27 = scalar_select %p2537_p13, 1, 0 }
  0x27   : > { %p2542_p2 = pnand %p2114_p11, %p154_p0  ;;  %s2412_s29 = smov [#allocation2]  }
  0x28   : > { %s172_s30 = sshll.u32 %s2412_s29, 4  ;;  %s2120_s4 = sshll.u32 %s188_s23, 4  ;;  %s173_s30 = int_to_ptr.vmem [resolvable:$true] %s172_s30 }
  0x29   : > { %p2165_p4 = pneg %p2542_p2  ;;  %s2153_s7 = sshll.u32 %s2402_s16, 8 }
  0x2a   : > { %s214_s8 = scalar_lea.vmem [#allocation7], %s2120_s4  ;;  %s220_s22 = scalar_lea.hbm %s3146_s2, %s2153_s7 }
  0x2b   : > { %s222_s9 = sshll.u32 %s214_s8, 4  ;;  %p2553_p1 = pnand %p2165_p4, %p90_p5  ;;  %s223_s9 = int_to_ptr.vmem [resolvable:$true] %s222_s9 }
  0x2c   : > { %s2279_s23 = scalar_lea.vmem %s173_s30, 2048  ;;  %p2287_p0 = scmp.lt.s32.totalorder %s173_s30, %s173_s30 }
  0x2d   : > { %p2270_p3 = pneg %p2553_p1  ;;  %p2280_p6 = scmp.ne.s32.totalorder %s173_s30, %s2279_s23 }
  0x2e   : > { %p2288_p8 = scmp.lt.s32.totalorder %s2279_s23, %s2279_s23 }
  0x2f   : > { %p2282_p9 = pnand %p2280_p6, %p2270_p3 }
  0x30   : > { %p2289_p13 = por %p2288_p8, %p2287_p0 }
  0x31   : > { %p2283_p11 = pneg %p2282_p9 }
  0x33   : > { %p2290_p12 = pnand %p2289_p13, %p2283_p11 }
  0x35   : > { %2293 = shalt.err (!%p2290_p12)
}
  0x36   : > { %s2413_s29 = smov 64   ;;  %s2307_s7 = scalar_lea.vmem %s223_s9, 256 }
  0x37   : > { %2168 = dma.hbm_to_vmem [thread:$0]  (!%p2553_p1), %s3144_s0, 2048, %s173_s30, [#allocation3], %s2409_s11, %s2409_s11, %s2413_s29  }
  0x38   : > { %p2308_p4 = scmp.ne.s32.totalorder %s223_s9, %s2307_s7  ;;  %p3157_p3 = pneg %p2500_p7 }
  0x39   : > { %s2414_s19 = smov [#allocation7]  }
  0x3a   : > { %p2310_p6 = pnand %p2308_p4, %p3157_p3  ;;  %s2312_s20 = sshll.u32 %s2414_s19, 4  ;;  %s2313_s20 = int_to_ptr.vmem [resolvable:$false] %s2312_s20 }
  0x3b   : > { %s2314_s23 = scalar_lea.vmem %s2313_s20, 512  ;;  %p2315_p8 = scmp.lt.s32.totalorder %s223_s9, %s2313_s20 }
  0x3c   : > { %p2311_p9 = pneg %p2310_p6  ;;  %p2316_p12 = scmp.lt.s32.totalorder %s2314_s23, %s2307_s7 }
  0x3e   : > { %p2317_p13 = por %p2316_p12, %p2315_p8 }
  0x40   : > { %p2318_p11 = pnand %p2317_p13, %p2311_p9 }
  0x42   : > { %2321 = shalt.err (!%p2318_p11)
}
  0x43   : > { %2175 = dma.hbm_to_vmem [thread:$0]  (!%p2500_p7), %s220_s22, 256, %s223_s9, %s2504_s6  }
  0x44   : > { %231 = sbr.rel (%p2542_p2) target bundleno = 819 (0x333), region = 32 }
  0x49   : > { %2373 = dma.done.wait (%p90_p5), [#allocation3], 2048  }
  0x4a   : > { %2375 = vsyncadd (%p90_p5), [#allocation3], 4294965248  ;;  %s237_s11 = sand.u32 1, %s2516_s21   ;;  %s2583_s30 = sand.u32 1, %s2390_s13  }
  0x4b   : > { %s2125_s10 = sshll.u32 %s2583_s30, 11  ;;  %s238_s5 = scalar_lea.sflag [#allocation6], %s237_s11 }
  0x4c   : > { %s2586_s29 = scalar_lea.vmem [#allocation5], %s2125_s10 }
  0x4d   : > { %2377 = dma.done.wait (%p2525_p10), %s238_s5, 33024  }
  0x4e   : > { %2379 = vsyncadd (%p2525_p10), %s238_s5, 4294934272  ;;  %v314_v0 = vld [vmem:[%s2586_s29 + $0x68] sm:$0xff]  ;;  %v313_v2 = vld [vmem:[%s2586_s29 + $0x60] sm:$0xff]  ;;  %s2126_s6 = sshll.u32 %s2583_s30, 4  ;;  %s2127_s25 = sshll.u32 %s2583_s30, 6 }
  0x4f   : > { %v346_v1 = vld [vmem:[%s2586_s29 + $0x168] sm:$0xff]  ;;  %v582_v3 = vunpack.c.l.s8.bf16 %v314_v0  ;;  %v586_v4 = vunpack.c.h.s8.bf16 %v314_v0  ;;  %v345_v7 = vld [vmem:[%s2586_s29 + $0x160] sm:$0xff]  ;;  %v585_v8 = vunpack.c.h.s8.bf16 %v313_v2  ;;  %v581_v12 = vunpack.c.l.s8.bf16 %v313_v2  ;;  %s2985_s21 = scalar_lea.vmem [#allocation7], %s2126_s6  ;;  %s3047_s28 = scalar_lea.vmem [#allocation8], %s2127_s25 }
  0x50   : > { %v646_v5 = vunpack.c.l.s8.bf16 %v346_v1  ;;  %v650_v6 = vunpack.c.h.s8.bf16 %v346_v1  ;;  %v649_v9 = vunpack.c.h.s8.bf16 %v345_v7  ;;  %v310_v10 = vld [vmem:[%s2586_s29 + $0x48] sm:$0xff]  ;;  %v645_v13 = vunpack.c.l.s8.bf16 %v345_v7  ;;  %v309_v16 = vld [vmem:[%s2586_s29 + $0x40] sm:$0xff]  ;;  %s1985_s9 = sshll.u32 %s3047_s28, 4  ;;  %s2154_s22 = sshll.u32 %s2398_s15, 9  ;;  %s3088_s9 = int_to_ptr.vmem [resolvable:$true] %s1985_s9 }
  0x51   : > { %v342_v11 = vld [vmem:[%s2586_s29 + $0x148] sm:$0xff]  ;;  %1149 = vmatprep.subr.bf16.mxu0 %v586_v4  ;;  %v578_v14 = vunpack.c.h.s8.bf16 %v310_v10  ;;  %v341_v17 = vld [vmem:[%s2586_s29 + $0x140] sm:$0xff]  ;;  %v577_v18 = vunpack.c.h.s8.bf16 %v309_v16  ;;  %v574_v20 = vunpack.c.l.s8.bf16 %v310_v10  ;;  %v573_v24 = vunpack.c.l.s8.bf16 %v309_v16  ;;  %s3094_s7 = scalar_lea.hbm %s3147_s3, %s2154_s22  ;;  %s1969_s19 = scalar_lea.sflag [#allocation4], %s2583_s30 }
  0x52   : > { %1192 = vmatprep.subr.bf16.mxu1 %v650_v6  ;;  %1150 = vmatpush1.bf16.msra.mxu0 %v585_v8  ;;  %v642_v15 = vunpack.c.h.s8.bf16 %v342_v11  ;;  %v641_v19 = vunpack.c.h.s8.bf16 %v341_v17  ;;  %v638_v21 = vunpack.c.l.s8.bf16 %v342_v11  ;;  %v306_v22 = vld [vmem:[%s2586_s29 + $0x28] sm:$0xff]  ;;  %v637_v25 = vunpack.c.l.s8.bf16 %v341_v17  ;;  %v305_v28 = vld [vmem:[%s2586_s29 + $0x20] sm:$0xff]  ;;  %s2322_s20 = scalar_lea.vmem %s3088_s9, 1024  ;;  %p3158_p5 = scmp.ne.s32.totalorder %s3153_s26, 0 }
  0x53   : > { %1193 = vmatpush1.bf16.msra.mxu1 %v649_v9  ;;  %1151 = vmatprep.subr.bf16.mxu0 %v582_v3  ;;  %v338_v23 = vld [vmem:[%s2586_s29 + $0x128] sm:$0xff]  ;;  %v570_v26 = vunpack.c.h.s8.bf16 %v306_v22  ;;  %v337_v29 = vld [vmem:[%s2586_s29 + $0x120] sm:$0xff]  ;;  %v569_v34 = vunpack.c.h.s8.bf16 %v305_v28  ;;  %v566_v36 = vunpack.c.l.s8.bf16 %v306_v22  ;;  %v565_v42 = vunpack.c.l.s8.bf16 %v305_v28  ;;  %p2323_p7 = scmp.ne.s32.totalorder %s3088_s9, %s2322_s20  ;;  %s2415_s15 = smov [#allocation8]  }
  0x54   : > { %1194 = vmatprep.subr.bf16.mxu1 %v646_v5  ;;  %v634_v27 = vunpack.c.h.s8.bf16 %v338_v23  ;;  %v2604_v30 = vld [vmem:[#allocation2] sm:$0xff]  ;;  %v2608_v32 = vld [vmem:[#allocation2 + $0x8] sm:$0xff]  ;;  %v633_v35 = vunpack.c.h.s8.bf16 %v337_v29  ;;  %v630_v37 = vunpack.c.l.s8.bf16 %v338_v23  ;;  %v629_v43 = vunpack.c.l.s8.bf16 %v337_v29  ;;  %s2326_s23 = sshll.u32 %s2415_s15, 4  ;;  %s2327_s23 = int_to_ptr.vmem [resolvable:$false] %s2326_s23 }
  0x55   : > { %v2606_v31 = vld [vmem:[#allocation2 + $0x40] sm:$0xff]  ;;  %v2610_v33 = vld [vmem:[#allocation2 + $0x48] sm:$0xff]  ;;  %p2324_p10 = pnand %p2323_p7, %p3158_p5  ;;  %s2328_s11 = scalar_lea.vmem %s2327_s23, 2048 }
  0x56   : > { %1152 = vmatpush1.bf16.msra.mxu0 %v581_v12  ;;  %v2614_v38 = vcombine.high %v2604_v30, %v2606_v31  ;;  %v302_v39 = vld [vmem:[%s2586_s29 + $0x8] sm:$0xff]  ;;  %v2620_v41 = vcombine.high %v2608_v32, %v2610_v33  ;;  %v301_v46 = vld [vmem:[%s2586_s29] sm:$0xff]  ;;  %p2329_p1 = scmp.lt.s32.totalorder %s3088_s9, %s2327_s23  ;;  %p2330_p0 = scmp.lt.s32.totalorder %s2328_s11, %s2322_s20 }
  0x57   : > { %1195 = vmatpush1.bf16.msra.mxu1 %v645_v13  ;;  %1153 = vmatprep.subr.bf16.mxu0 %v578_v14  ;;  %v334_v40 = vld [vmem:[%s2586_s29 + $0x108] sm:$0xff]  ;;  %v562_v44 = vunpack.c.h.s8.bf16 %v302_v39  ;;  %v333_v47 = vld [vmem:[%s2586_s29 + $0x100] sm:$0xff]  ;;  %v561_v48 = vunpack.c.h.s8.bf16 %v301_v46  ;;  %v558_v50 = vunpack.c.l.s8.bf16 %v302_v39  ;;  %v557_v54 = vunpack.c.l.s8.bf16 %v301_v46  ;;  %p2325_p2 = pneg %p2324_p10 }
  0x58   : > { %1196 = vmatprep.subr.bf16.mxu1 %v642_v15  ;;  %1181 = vmatprep.mubr.bf16.mxu0 %v2614_v38  ;;  %v626_v45 = vunpack.c.h.s8.bf16 %v334_v40  ;;  %v625_v49 = vunpack.c.h.s8.bf16 %v333_v47  ;;  %v622_v51 = vunpack.c.l.s8.bf16 %v334_v40  ;;  %v330_v52 = vld [vmem:[%s2586_s29 + $0xe8] sm:$0xff]  ;;  %v621_v55 = vunpack.c.l.s8.bf16 %v333_v47  ;;  %v329_v58 = vld [vmem:[%s2586_s29 + $0xe0] sm:$0xff]  ;;  %p2331_p4 = por %p2330_p0, %p2329_p1 }
  0x59   : > { %1224 = vmatprep.mubr.bf16.mxu1 %v2620_v41  ;;  %v362_v53 = vld [vmem:[%s2586_s29 + $0x1e8] sm:$0xff]  ;;  %v618_v56 = vunpack.c.h.s8.bf16 %v330_v52  ;;  %v361_v59 = vld [vmem:[%s2586_s29 + $0x1e0] sm:$0xff]  ;;  %v617_v60 = vunpack.c.h.s8.bf16 %v329_v58  ;;  %v614_v62 = vunpack.c.l.s8.bf16 %v330_v52  ;;  %v613_v2 = vunpack.c.l.s8.bf16 %v329_v58 }
  0x5a   : > { %1154 = vmatpush1.bf16.msra.mxu0 %v577_v18  ;;  %v682_v57 = vunpack.c.h.s8.bf16 %v362_v53  ;;  %v681_v61 = vunpack.c.h.s8.bf16 %v361_v59  ;;  %v678_v63 = vunpack.c.l.s8.bf16 %v362_v53  ;;  %v326_v0 = vld [vmem:[%s2586_s29 + $0xc8] sm:$0xff]  ;;  %v677_v3 = vunpack.c.l.s8.bf16 %v361_v59  ;;  %v325_v6 = vld [vmem:[%s2586_s29 + $0xc0] sm:$0xff]  ;;  %v2656_v53 = vld [vmem:[#allocation2 + $0x50] sm:$0xff]  ;;  %p2332_p3 = pnand %p2331_p4, %p2325_p2 }
  0x5b   : > { %1197 = vmatpush1.bf16.msra.mxu1 %v641_v19  ;;  %1155 = vmatprep.subr.bf16.mxu0 %v574_v20  ;;  %v358_v1 = vld [vmem:[%s2586_s29 + $0x1c8] sm:$0xff]  ;;  %v610_v4 = vunpack.c.h.s8.bf16 %v326_v0  ;;  %v357_v7 = vld [vmem:[%s2586_s29 + $0x1c0] sm:$0xff]  ;;  %v609_v8 = vunpack.c.h.s8.bf16 %v325_v6  ;;  %v606_v10 = vunpack.c.l.s8.bf16 %v326_v0  ;;  %v605_v14 = vunpack.c.l.s8.bf16 %v325_v6 }
  0x5c   : > { %1198 = vmatprep.subr.bf16.mxu1 %v638_v21  ;;  %v674_v5 = vunpack.c.h.s8.bf16 %v358_v1  ;;  %v673_v9 = vunpack.c.h.s8.bf16 %v357_v7  ;;  %v670_v11 = vunpack.c.l.s8.bf16 %v358_v1  ;;  %v322_v12 = vld [vmem:[%s2586_s29 + $0xa8] sm:$0xff]  ;;  %v669_v15 = vunpack.c.l.s8.bf16 %v357_v7  ;;  %v321_v18 = vld [vmem:[%s2586_s29 + $0xa0] sm:$0xff] }
  0x5d   : > { %v354_v13 = vld [vmem:[%s2586_s29 + $0x1a8] sm:$0xff]  ;;  %v602_v16 = vunpack.c.h.s8.bf16 %v322_v12  ;;  %v353_v19 = vld [vmem:[%s2586_s29 + $0x1a0] sm:$0xff]  ;;  %v601_v20 = vunpack.c.h.s8.bf16 %v321_v18  ;;  %v598_v22 = vunpack.c.l.s8.bf16 %v322_v12  ;;  %v2654_v52 = vcombine.low %v2608_v32, %v2610_v33 }
  0x5e   : > { %1156 = vmatpush1.bf16.msra.mxu0 %v573_v24  ;;  %v666_v17 = vunpack.c.h.s8.bf16 %v354_v13  ;;  %v665_v21 = vunpack.c.h.s8.bf16 %v353_v19  ;;  %v662_v23 = vunpack.c.l.s8.bf16 %v354_v13  ;;  %v318_v24 = vld [vmem:[%s2586_s29 + $0x88] sm:$0xff]  ;;  %v373_v0 = vld [vmem:[%s2586_s29 + $0x240] sm:$0xff] }
  0x5f   : > { %1199 = vmatpush1.bf16.msra.mxu1 %v637_v25  ;;  %1157 = vmatprep.subr.bf16.mxu0 %v570_v26  ;;  %v350_v25 = vld [vmem:[%s2586_s29 + $0x188] sm:$0xff]  ;;  %v597_v26 = vunpack.c.l.s8.bf16 %v321_v18  ;;  %v594_v28 = vunpack.c.h.s8.bf16 %v318_v24  ;;  %v590_v39 = vunpack.c.l.s8.bf16 %v318_v24  ;;  %v405_v1 = vld [vmem:[%s2586_s29 + $0x340] sm:$0xff] }
  0x60   : > { %1200 = vmatprep.subr.bf16.mxu1 %v634_v27  ;;  %v661_v27 = vunpack.c.l.s8.bf16 %v353_v19  ;;  %v658_v29 = vunpack.c.h.s8.bf16 %v350_v25  ;;  %v654_v40 = vunpack.c.l.s8.bf16 %v350_v25  ;;  %v406_v59 = vld [vmem:[%s2586_s29 + $0x348] sm:$0xff]  ;;  %v369_v12 = vld [vmem:[%s2586_s29 + $0x220] sm:$0xff] }
  0x61   : > { %v370_v6 = vld [vmem:[%s2586_s29 + $0x228] sm:$0xff]  ;;  %v401_v13 = vld [vmem:[%s2586_s29 + $0x320] sm:$0xff] }
  0x62   : > { %1158 = vmatpush1.bf16.msra.mxu0 %v569_v34  ;;  %v317_v34 = vld [vmem:[%s2586_s29 + $0x80] sm:$0xff]  ;;  %v402_v7 = vld [vmem:[%s2586_s29 + $0x328] sm:$0xff] }
  0x63   : > { %1201 = vmatpush1.bf16.msra.mxu1 %v633_v35  ;;  %1159 = vmatprep.subr.bf16.mxu0 %v566_v36  ;;  %v349_v35 = vld [vmem:[%s2586_s29 + $0x180] sm:$0xff]  ;;  %v593_v36 = vunpack.c.h.s8.bf16 %v317_v34  ;;  %v366_v18 = vld [vmem:[%s2586_s29 + $0x208] sm:$0xff] }
  0x64   : > { %1202 = vmatprep.subr.bf16.mxu1 %v630_v37  ;;  %v657_v37 = vunpack.c.h.s8.bf16 %v349_v35  ;;  %v398_v19 = vld [vmem:[%s2586_s29 + $0x308] sm:$0xff]  ;;  %v365_v24 = vld [vmem:[%s2586_s29 + $0x200] sm:$0xff] }
  0x65   : > { %v397_v25 = vld [vmem:[%s2586_s29 + $0x300] sm:$0xff] }
  0x66   : > { %1160 = vmatpush1.bf16.msra.mxu0 %v565_v42  ;;  %v378_v42 = vld [vmem:[%s2586_s29 + $0x268] sm:$0xff] }
  0x67   : > { %1203 = vmatpush1.bf16.msra.mxu1 %v629_v43  ;;  %1161 = vmatprep.subr.bf16.mxu0 %v562_v44  ;;  %v410_v43 = vld [vmem:[%s2586_s29 + $0x368] sm:$0xff]  ;;  %v589_v44 = vunpack.c.l.s8.bf16 %v317_v34  ;;  %v714_v46 = vunpack.c.h.s8.bf16 %v378_v42  ;;  %v710_v58 = vunpack.c.l.s8.bf16 %v378_v42  ;;  %v393_v42 = vld [vmem:[%s2586_s29 + $0x2e0] sm:$0xff] }
  0x68   : > { %1204 = vmatprep.subr.bf16.mxu1 %v626_v45  ;;  %v653_v45 = vunpack.c.l.s8.bf16 %v349_v35  ;;  %v778_v47 = vunpack.c.h.s8.bf16 %v410_v43  ;;  %v394_v34 = vld [vmem:[%s2586_s29 + $0x2e8] sm:$0xff] }
  0x69   : > { %v426_v35 = vld [vmem:[%s2586_s29 + $0x3e8] sm:$0xff] }
  0x6a   : > { %1162 = vmatpush1.bf16.msra.mxu0 %v561_v48  ;;  %v377_v48 = vld [vmem:[%s2586_s29 + $0x260] sm:$0xff] }
  0x6b   : > { %1205 = vmatpush1.bf16.msra.mxu1 %v625_v49  ;;  %1163 = vmatprep.subr.bf16.mxu0 %v558_v50  ;;  %v409_v49 = vld [vmem:[%s2586_s29 + $0x360] sm:$0xff]  ;;  %v2646_v50 = vld [vmem:[#allocation2 + $0x10] sm:$0xff] }
  0x6c   : > { %1206 = vmatprep.subr.bf16.mxu1 %v622_v51  ;;  %v2650_v51 = vcombine.low %v2604_v30, %v2606_v31  ;;  %v774_v30 = vunpack.c.l.s8.bf16 %v410_v43  ;;  %v374_v31 = vld [vmem:[%s2586_s29 + $0x248] sm:$0xff]  ;;  %v2666_v32 = vcombine.high %v2646_v50, %v2656_v53  ;;  %v425_v43 = vld [vmem:[%s2586_s29 + $0x3e0] sm:$0xff] }
  0x6e   : > { %1164 = vmatpush1.bf16.msra.mxu0 %v557_v54  ;;  %v2658_v54 = vld [vmem:[#allocation2 + $0x18] sm:$0xff] }
  0x6f   : > { %1207 = vmatpush1.bf16.msra.mxu1 %v621_v55  ;;  %1165 = vmatprep.subr.bf16.mxu0 %v618_v56  ;;  %v2660_v55 = vld [vmem:[#allocation2 + $0x58] sm:$0xff]  ;;  %v713_v56 = vunpack.c.h.s8.bf16 %v377_v48 }
  0x70   : > { %1208 = vmatprep.subr.bf16.mxu1 %v682_v57  ;;  %v777_v57 = vunpack.c.h.s8.bf16 %v409_v49  ;;  %v2670_v33 = vcombine.high %v2658_v54, %v2660_v55 }
  0x72   : > { %1166 = vmatpush2.bf16.msra.mxu0 %v617_v60  ;;  %v709_v60 = vunpack.c.l.s8.bf16 %v377_v48  ;;  %v390_v48 = vld [vmem:[%s2586_s29 + $0x2c8] sm:$0xff] }
  0x73   : > { %1209 = vmatpush2.bf16.msra.mxu1 %v681_v61  ;;  %1167 = vmatprep.subr.bf16.mxu0 %v614_v62  ;;  %v773_v61 = vunpack.c.l.s8.bf16 %v409_v49  ;;  %v706_v62 = vunpack.c.h.s8.bf16 %v374_v31  ;;  %v422_v49 = vld [vmem:[%s2586_s29 + $0x3c8] sm:$0xff] }
  0x74   : > { %1210 = vmatprep.subr.bf16.mxu1 %v678_v63  ;;  %v770_v63 = vunpack.c.h.s8.bf16 %v406_v59 }
  0x76   : > { %1168 = vmatpush2.bf16.msra.mxu0 %v613_v2  ;;  %v705_v2 = vunpack.c.h.s8.bf16 %v373_v0 }
  0x77   : > { %1211 = vmatpush2.bf16.msra.mxu1 %v677_v3  ;;  %1169 = vmatprep.subr.bf16.mxu0 %v610_v4  ;;  %v769_v3 = vunpack.c.h.s8.bf16 %v405_v1  ;;  %v702_v4 = vunpack.c.l.s8.bf16 %v374_v31  ;;  %v389_v31 = vld [vmem:[%s2586_s29 + $0x2c0] sm:$0xff] }
  0x78   : > { %1212 = vmatprep.subr.bf16.mxu1 %v674_v5  ;;  %v766_v5 = vunpack.c.l.s8.bf16 %v406_v59  ;;  %v421_v59 = vld [vmem:[%s2586_s29 + $0x3c0] sm:$0xff] }
  0x7a   : > { %1170 = vmatpush2.bf16.msra.mxu0 %v609_v8  ;;  %v701_v8 = vunpack.c.l.s8.bf16 %v373_v0  ;;  %v386_v0 = vld [vmem:[%s2586_s29 + $0x2a8] sm:$0xff] }
  0x7b   : > { %1213 = vmatpush2.bf16.msra.mxu1 %v673_v9  ;;  %1171 = vmatprep.subr.bf16.mxu0 %v606_v10  ;;  %v765_v9 = vunpack.c.l.s8.bf16 %v405_v1  ;;  %v698_v10 = vunpack.c.h.s8.bf16 %v370_v6  ;;  %v418_v1 = vld [vmem:[%s2586_s29 + $0x3a8] sm:$0xff] }
  0x7c   : > { %1214 = vmatprep.subr.bf16.mxu1 %v670_v11  ;;  %v762_v11 = vunpack.c.h.s8.bf16 %v402_v7 }
  0x7e   : > { %1172 = vmatpush2.bf16.msra.mxu0 %v605_v14  ;;  %v697_v14 = vunpack.c.h.s8.bf16 %v369_v12 }
  0x7f   : > { %1215 = vmatpush2.bf16.msra.mxu1 %v669_v15  ;;  %1173 = vmatprep.subr.bf16.mxu0 %v602_v16  ;;  %v761_v15 = vunpack.c.h.s8.bf16 %v401_v13  ;;  %v694_v16 = vunpack.c.l.s8.bf16 %v370_v6  ;;  %v385_v6 = vld [vmem:[%s2586_s29 + $0x2a0] sm:$0xff] }
  0x80   : > { %1216 = vmatprep.subr.bf16.mxu1 %v666_v17  ;;  %v758_v17 = vunpack.c.l.s8.bf16 %v402_v7  ;;  %v417_v7 = vld [vmem:[%s2586_s29 + $0x3a0] sm:$0xff] }
  0x82   : > { %1174 = vmatpush2.bf16.msra.mxu0 %v601_v20  ;;  %v693_v20 = vunpack.c.l.s8.bf16 %v369_v12  ;;  %v382_v12 = vld [vmem:[%s2586_s29 + $0x288] sm:$0xff] }
  0x83   : > { %1217 = vmatpush2.bf16.msra.mxu1 %v665_v21  ;;  %1175 = vmatprep.subr.bf16.mxu0 %v598_v22  ;;  %v757_v21 = vunpack.c.l.s8.bf16 %v401_v13  ;;  %v690_v22 = vunpack.c.h.s8.bf16 %v366_v18  ;;  %v414_v13 = vld [vmem:[%s2586_s29 + $0x388] sm:$0xff] }
  0x84   : > { %1218 = vmatprep.subr.bf16.mxu1 %v662_v23  ;;  %v754_v23 = vunpack.c.h.s8.bf16 %v398_v19 }
  0x86   : > { %1176 = vmatpush2.bf16.msra.mxu0 %v597_v26  ;;  %v689_v26 = vunpack.c.h.s8.bf16 %v365_v24 }
  0x87   : > { %1219 = vmatpush2.bf16.msra.mxu1 %v661_v27  ;;  %1177 = vmatprep.subr.bf16.mxu0 %v594_v28  ;;  %v753_v27 = vunpack.c.h.s8.bf16 %v397_v25  ;;  %v686_v28 = vunpack.c.l.s8.bf16 %v366_v18  ;;  %v381_v18 = vld [vmem:[%s2586_s29 + $0x280] sm:$0xff] }
  0x88   : > { %1220 = vmatprep.subr.bf16.mxu1 %v658_v29  ;;  %v750_v29 = vunpack.c.l.s8.bf16 %v398_v19  ;;  %v413_v19 = vld [vmem:[%s2586_s29 + $0x380] sm:$0xff] }
  0x8a   : > { %1178 = vmatpush2.bf16.msra.mxu0 %v593_v36  ;;  %v685_v36 = vunpack.c.l.s8.bf16 %v365_v24  ;;  %v442_v24 = vld [vmem:[%s2586_s29 + $0x468] sm:$0xff] }
  0x8b   : > { %1221 = vmatpush2.bf16.msra.mxu1 %v657_v37  ;;  %1179 = vmatprep.subr.bf16.mxu0 %v590_v39  ;;  %v749_v37 = vunpack.c.l.s8.bf16 %v397_v25  ;;  %v746_v39 = vunpack.c.h.s8.bf16 %v394_v34  ;;  %v474_v25 = vld [vmem:[%s2586_s29 + $0x568] sm:$0xff] }
  0x8c   : > { %1222 = vmatprep.subr.bf16.mxu1 %v654_v40  ;;  %v810_v40 = vunpack.c.h.s8.bf16 %v426_v35 }
  0x8e   : > { %1180 = vmatpush2.bf16.msra.mxu0 %v589_v44  ;;  %v745_v44 = vunpack.c.h.s8.bf16 %v393_v42 }
  0x8f   : > { %1223 = vmatpush2.bf16.msra.mxu1 %v653_v45  ;;  %1235 = vmatprep.subr.bf16.mxu0 %v714_v46  ;;  %v809_v45 = vunpack.c.h.s8.bf16 %v425_v43  ;;  %v742_v46 = vunpack.c.l.s8.bf16 %v394_v34  ;;  %v441_v34 = vld [vmem:[%s2586_s29 + $0x460] sm:$0xff] }
  0x90   : > { %1278 = vmatprep.subr.bf16.mxu1 %v778_v47  ;;  %v806_v47 = vunpack.c.l.s8.bf16 %v426_v35  ;;  %v473_v35 = vld [vmem:[%s2586_s29 + $0x560] sm:$0xff] }
  0x91   : > { %1182 = vmatmul.mubr.bf16.vlgmr.msra.gmra.mxu0 %v2650_v51 }
  0x92   : > { %1225 = vmatmul.mubr.bf16.vlgmr.msra.gmra.mxu1 %v2654_v52  ;;  %1236 = vmatpush1.bf16.msra.mxu0 %v713_v56  ;;  %v741_v56 = vunpack.c.l.s8.bf16 %v393_v42  ;;  %v2718_v42 = vld [vmem:[#allocation2 + $0x28] sm:$0xff] }
  0x93   : > { %1279 = vmatpush1.bf16.msra.mxu1 %v777_v57  ;;  %1237 = vmatprep.subr.bf16.mxu0 %v710_v58  ;;  %v805_v57 = vunpack.c.l.s8.bf16 %v425_v43  ;;  %v738_v58 = vunpack.c.h.s8.bf16 %v390_v48  ;;  %v2720_v43 = vld [vmem:[#allocation2 + $0x68] sm:$0xff] }
  0x94   : > { %1280 = vmatprep.subr.bf16.mxu1 %v774_v30  ;;  %1267 = vmatprep.mubr.bf16.mxu0 %v2666_v32  ;;  %v802_v30 = vunpack.c.h.s8.bf16 %v422_v49 }
  0x95   : > { %1310 = vmatprep.mubr.bf16.mxu1 %v2670_v33 }
  0x96   : > { %1238 = vmatpush1.bf16.msra.mxu0 %v709_v60  ;;  %v737_v60 = vunpack.c.h.s8.bf16 %v389_v31 }
  0x97   : > { %1281 = vmatpush1.bf16.msra.mxu1 %v773_v61  ;;  %1239 = vmatprep.subr.bf16.mxu0 %v706_v62  ;;  %v801_v61 = vunpack.c.h.s8.bf16 %v421_v59  ;;  %v734_v62 = vunpack.c.l.s8.bf16 %v390_v48  ;;  %v837_v48 = vunpack.c.l.s8.bf16 %v441_v34 }
  0x98   : > { %1282 = vmatprep.subr.bf16.mxu1 %v770_v63  ;;  %v798_v63 = vunpack.c.l.s8.bf16 %v422_v49  ;;  %v901_v49 = vunpack.c.l.s8.bf16 %v473_v35 }
  0x9a   : > { %1240 = vmatpush1.bf16.msra.mxu0 %v705_v2  ;;  %v733_v2 = vunpack.c.l.s8.bf16 %v389_v31 }
  0x9b   : > { %1283 = vmatpush1.bf16.msra.mxu1 %v769_v3  ;;  %1241 = vmatprep.subr.bf16.mxu0 %v702_v4  ;;  %v797_v3 = vunpack.c.l.s8.bf16 %v421_v59  ;;  %v730_v4 = vunpack.c.h.s8.bf16 %v386_v0 }
  0x9c   : > { %1284 = vmatprep.subr.bf16.mxu1 %v766_v5  ;;  %v794_v5 = vunpack.c.h.s8.bf16 %v418_v1 }
  0x9e   : > { %1242 = vmatpush1.bf16.msra.mxu0 %v701_v8  ;;  %v729_v8 = vunpack.c.h.s8.bf16 %v385_v6 }
  0x9f   : > { %1285 = vmatpush1.bf16.msra.mxu1 %v765_v9  ;;  %1243 = vmatprep.subr.bf16.mxu0 %v698_v10  ;;  %v793_v9 = vunpack.c.h.s8.bf16 %v417_v7  ;;  %v726_v10 = vunpack.c.l.s8.bf16 %v386_v0 }
  0xa0   : > { %1286 = vmatprep.subr.bf16.mxu1 %v762_v11  ;;  %v790_v11 = vunpack.c.l.s8.bf16 %v418_v1 }
  0xa2   : > { %1244 = vmatpush1.bf16.msra.mxu0 %v697_v14  ;;  %v725_v14 = vunpack.c.l.s8.bf16 %v385_v6 }
  0xa3   : > { %1287 = vmatpush1.bf16.msra.mxu1 %v761_v15  ;;  %1245 = vmatprep.subr.bf16.mxu0 %v694_v16  ;;  %v789_v15 = vunpack.c.l.s8.bf16 %v417_v7  ;;  %v722_v16 = vunpack.c.h.s8.bf16 %v382_v12 }
  0xa4   : > { %1288 = vmatprep.subr.bf16.mxu1 %v758_v17  ;;  %v786_v17 = vunpack.c.h.s8.bf16 %v414_v13 }
  0xa6   : > { %1246 = vmatpush1.bf16.msra.mxu0 %v693_v20  ;;  %v721_v20 = vunpack.c.h.s8.bf16 %v381_v18 }
  0xa7   : > { %1289 = vmatpush1.bf16.msra.mxu1 %v757_v21  ;;  %1247 = vmatprep.subr.bf16.mxu0 %v690_v22  ;;  %v785_v21 = vunpack.c.h.s8.bf16 %v413_v19  ;;  %v718_v22 = vunpack.c.l.s8.bf16 %v382_v12 }
  0xa8   : > { %1290 = vmatprep.subr.bf16.mxu1 %v754_v23  ;;  %v782_v23 = vunpack.c.l.s8.bf16 %v414_v13 }
  0xaa   : > { %1248 = vmatpush1.bf16.msra.mxu0 %v689_v26  ;;  %v717_v26 = vunpack.c.l.s8.bf16 %v381_v18 }
  0xab   : > { %1291 = vmatpush1.bf16.msra.mxu1 %v753_v27  ;;  %1249 = vmatprep.subr.bf16.mxu0 %v686_v28  ;;  %v781_v27 = vunpack.c.l.s8.bf16 %v413_v19  ;;  %v842_v28 = vunpack.c.h.s8.bf16 %v442_v24 }
  0xac   : > { %1292 = vmatprep.subr.bf16.mxu1 %v750_v29  ;;  %v906_v29 = vunpack.c.h.s8.bf16 %v474_v25 }
  0xae   : > { %1250 = vmatpush1.bf16.msra.mxu0 %v685_v36  ;;  %v2706_v36 = vld [vmem:[#allocation2 + $0x20] sm:$0xff] }
  0xaf   : > { %1293 = vmatpush1.bf16.msra.mxu1 %v749_v37  ;;  %1251 = vmatprep.subr.bf16.mxu0 %v746_v39  ;;  %v2710_v37 = vcombine.low %v2646_v50, %v2656_v53  ;;  %v2714_v39 = vcombine.low %v2658_v54, %v2660_v55  ;;  %v902_v50 = vunpack.c.l.s8.bf16 %v474_v25  ;;  %v438_v53 = vld [vmem:[%s2586_s29 + $0x448] sm:$0xff]  ;;  %v2730_v55 = vcombine.high %v2718_v42, %v2720_v43 }
  0xb0   : > { %1294 = vmatprep.subr.bf16.mxu1 %v810_v40  ;;  %v2716_v40 = vld [vmem:[#allocation2 + $0x60] sm:$0xff] }
  0xb1   : > { %v2726_v54 = vcombine.high %v2706_v36, %v2716_v40 }
  0xb2   : > { %1252 = vmatpush2.bf16.msra.mxu0 %v745_v44  ;;  %v841_v44 = vunpack.c.h.s8.bf16 %v441_v34 }
  0xb3   : > { %1295 = vmatpush2.bf16.msra.mxu1 %v809_v45  ;;  %1253 = vmatprep.subr.bf16.mxu0 %v742_v46  ;;  %v905_v45 = vunpack.c.h.s8.bf16 %v473_v35  ;;  %v838_v46 = vunpack.c.l.s8.bf16 %v442_v24 }
  0xb4   : > { %1296 = vmatprep.subr.bf16.mxu1 %v806_v47  ;;  %v470_v47 = vld [vmem:[%s2586_s29 + $0x548] sm:$0xff] }
  0xb6   : > { %1254 = vmatpush2.bf16.msra.mxu0 %v741_v56  ;;  %v834_v56 = vunpack.c.h.s8.bf16 %v438_v53 }
  0xb7   : > { %1297 = vmatpush2.bf16.msra.mxu1 %v805_v57  ;;  %1255 = vmatprep.subr.bf16.mxu0 %v738_v58  ;;  %v898_v57 = vunpack.c.h.s8.bf16 %v470_v47  ;;  %v437_v58 = vld [vmem:[%s2586_s29 + $0x440] sm:$0xff] }
  0xb8   : > { %1298 = vmatprep.subr.bf16.mxu1 %v802_v30  ;;  %v469_v30 = vld [vmem:[%s2586_s29 + $0x540] sm:$0xff]  ;;  %v833_v31 = vunpack.c.h.s8.bf16 %v437_v58  ;;  %v829_v0 = vunpack.c.l.s8.bf16 %v437_v58 }
  0xb9   : > { %v897_v59 = vunpack.c.h.s8.bf16 %v469_v30  ;;  %v893_v1 = vunpack.c.l.s8.bf16 %v469_v30 }
  0xba   : > { %1256 = vmatpush2.bf16.msra.mxu0 %v737_v60  ;;  %v830_v60 = vunpack.c.l.s8.bf16 %v438_v53 }
  0xbb   : > { %1299 = vmatpush2.bf16.msra.mxu1 %v801_v61  ;;  %1257 = vmatprep.subr.bf16.mxu0 %v734_v62  ;;  %v894_v61 = vunpack.c.l.s8.bf16 %v470_v47  ;;  %v434_v62 = vld [vmem:[%s2586_s29 + $0x428] sm:$0xff] }
  0xbc   : > { %1300 = vmatprep.subr.bf16.mxu1 %v798_v63  ;;  %v466_v63 = vld [vmem:[%s2586_s29 + $0x528] sm:$0xff] }
  0xbe   : > { %1258 = vmatpush2.bf16.msra.mxu0 %v733_v2  ;;  %v826_v2 = vunpack.c.h.s8.bf16 %v434_v62 }
  0xbf   : > { %1301 = vmatpush2.bf16.msra.mxu1 %v797_v3  ;;  %1259 = vmatprep.subr.bf16.mxu0 %v730_v4  ;;  %v890_v3 = vunpack.c.h.s8.bf16 %v466_v63  ;;  %v433_v4 = vld [vmem:[%s2586_s29 + $0x420] sm:$0xff] }
  0xc0   : > { %1302 = vmatprep.subr.bf16.mxu1 %v794_v5  ;;  %v465_v5 = vld [vmem:[%s2586_s29 + $0x520] sm:$0xff]  ;;  %v825_v6 = vunpack.c.h.s8.bf16 %v433_v4  ;;  %v821_v12 = vunpack.c.l.s8.bf16 %v433_v4 }
  0xc1   : > { %v889_v7 = vunpack.c.h.s8.bf16 %v465_v5  ;;  %v885_v13 = vunpack.c.l.s8.bf16 %v465_v5 }
  0xc2   : > { %1260 = vmatpush2.bf16.msra.mxu0 %v729_v8  ;;  %v822_v8 = vunpack.c.l.s8.bf16 %v434_v62 }
  0xc3   : > { %1303 = vmatpush2.bf16.msra.mxu1 %v793_v9  ;;  %1261 = vmatprep.subr.bf16.mxu0 %v726_v10  ;;  %v886_v9 = vunpack.c.l.s8.bf16 %v466_v63  ;;  %v430_v10 = vld [vmem:[%s2586_s29 + $0x408] sm:$0xff] }
  0xc4   : > { %1304 = vmatprep.subr.bf16.mxu1 %v790_v11  ;;  %v462_v11 = vld [vmem:[%s2586_s29 + $0x508] sm:$0xff] }
  0xc6   : > { %1262 = vmatpush2.bf16.msra.mxu0 %v725_v14  ;;  %v818_v14 = vunpack.c.h.s8.bf16 %v430_v10 }
  0xc7   : > { %1305 = vmatpush2.bf16.msra.mxu1 %v789_v15  ;;  %1263 = vmatprep.subr.bf16.mxu0 %v722_v16  ;;  %v882_v15 = vunpack.c.h.s8.bf16 %v462_v11  ;;  %v429_v16 = vld [vmem:[%s2586_s29 + $0x400] sm:$0xff] }
  0xc8   : > { %1306 = vmatprep.subr.bf16.mxu1 %v786_v17  ;;  %v461_v17 = vld [vmem:[%s2586_s29 + $0x500] sm:$0xff]  ;;  %v817_v18 = vunpack.c.h.s8.bf16 %v429_v16  ;;  %v813_v24 = vunpack.c.l.s8.bf16 %v429_v16 }
  0xc9   : > { %v881_v19 = vunpack.c.h.s8.bf16 %v461_v17  ;;  %v877_v25 = vunpack.c.l.s8.bf16 %v461_v17 }
  0xca   : > { %1264 = vmatpush2.bf16.msra.mxu0 %v721_v20  ;;  %v814_v20 = vunpack.c.l.s8.bf16 %v430_v10 }
  0xcb   : > { %1307 = vmatpush2.bf16.msra.mxu1 %v785_v21  ;;  %1265 = vmatprep.subr.bf16.mxu0 %v718_v22  ;;  %v878_v21 = vunpack.c.l.s8.bf16 %v462_v11  ;;  %v458_v22 = vld [vmem:[%s2586_s29 + $0x4e8] sm:$0xff] }
  0xcc   : > { %1308 = vmatprep.subr.bf16.mxu1 %v782_v23  ;;  %v490_v23 = vld [vmem:[%s2586_s29 + $0x5e8] sm:$0xff] }
  0xce   : > { %1266 = vmatpush2.bf16.msra.mxu0 %v717_v26  ;;  %v874_v26 = vunpack.c.h.s8.bf16 %v458_v22 }
  0xcf   : > { %1309 = vmatpush2.bf16.msra.mxu1 %v781_v27  ;;  %1321 = vmatprep.subr.bf16.mxu0 %v842_v28  ;;  %v938_v27 = vunpack.c.h.s8.bf16 %v490_v23  ;;  %v457_v28 = vld [vmem:[%s2586_s29 + $0x4e0] sm:$0xff] }
  0xd0   : > { %1364 = vmatprep.subr.bf16.mxu1 %v906_v29  ;;  %v489_v29 = vld [vmem:[%s2586_s29 + $0x5e0] sm:$0xff]  ;;  %v873_v34 = vunpack.c.h.s8.bf16 %v457_v28  ;;  %v869_v53 = vunpack.c.l.s8.bf16 %v457_v28  ;;  %v2766_v28 = vld [vmem:[#allocation2 + $0x30] sm:$0xff] }
  0xd1   : > { %1268 = vmatmul.mubr.bf16.vlgmr.msra.gmra.mxu0 %v2710_v37  ;;  %v937_v35 = vunpack.c.h.s8.bf16 %v489_v29  ;;  %v933_v47 = vunpack.c.l.s8.bf16 %v489_v29  ;;  %v2770_v29 = vcombine.low %v2706_v36, %v2716_v40  ;;  %v502_v40 = vld [vmem:[%s2586_s29 + $0x648] sm:$0xff] }
  0xd2   : > { %1311 = vmatmul.mubr.bf16.vlgmr.msra.gmra.mxu1 %v2714_v39  ;;  %1322 = vmatpush1.bf16.msra.mxu0 %v841_v44  ;;  %v870_v44 = vunpack.c.l.s8.bf16 %v458_v22 }
  0xd3   : > { %1365 = vmatpush1.bf16.msra.mxu1 %v905_v45  ;;  %1323 = vmatprep.subr.bf16.mxu0 %v838_v46  ;;  %v934_v45 = vunpack.c.l.s8.bf16 %v490_v23  ;;  %v454_v46 = vld [vmem:[%s2586_s29 + $0x4c8] sm:$0xff] }
  0xd4   : > { %1366 = vmatprep.subr.bf16.mxu1 %v902_v50  ;;  %1353 = vmatprep.mubr.bf16.mxu0 %v2726_v54  ;;  %v486_v50 = vld [vmem:[%s2586_s29 + $0x5c8] sm:$0xff] }
  0xd5   : > { %1396 = vmatprep.mubr.bf16.mxu1 %v2730_v55 }
  0xd6   : > { %1324 = vmatpush1.bf16.msra.mxu0 %v837_v48  ;;  %v866_v48 = vunpack.c.h.s8.bf16 %v454_v46 }
  0xd7   : > { %1367 = vmatpush1.bf16.msra.mxu1 %v901_v49  ;;  %1325 = vmatprep.subr.bf16.mxu0 %v834_v56  ;;  %v930_v49 = vunpack.c.h.s8.bf16 %v486_v50  ;;  %v453_v56 = vld [vmem:[%s2586_s29 + $0x4c0] sm:$0xff] }
  0xd8   : > { %1368 = vmatprep.subr.bf16.mxu1 %v898_v57  ;;  %v485_v57 = vld [vmem:[%s2586_s29 + $0x5c0] sm:$0xff]  ;;  %v865_v58 = vunpack.c.h.s8.bf16 %v453_v56  ;;  %v861_v62 = vunpack.c.l.s8.bf16 %v453_v56  ;;  %v962_v56 = vunpack.c.h.s8.bf16 %v502_v40 }
  0xd9   : > { %v929_v30 = vunpack.c.h.s8.bf16 %v485_v57  ;;  %v925_v63 = vunpack.c.l.s8.bf16 %v485_v57 }
  0xda   : > { %1326 = vmatpush1.bf16.msra.mxu0 %v833_v31  ;;  %v862_v31 = vunpack.c.l.s8.bf16 %v454_v46 }
  0xdb   : > { %1369 = vmatpush1.bf16.msra.mxu1 %v897_v59  ;;  %1327 = vmatprep.subr.bf16.mxu0 %v830_v60  ;;  %v926_v59 = vunpack.c.l.s8.bf16 %v486_v50  ;;  %v450_v60 = vld [vmem:[%s2586_s29 + $0x4a8] sm:$0xff] }
  0xdc   : > { %1370 = vmatprep.subr.bf16.mxu1 %v894_v61  ;;  %v482_v61 = vld [vmem:[%s2586_s29 + $0x5a8] sm:$0xff] }
  0xde   : > { %1328 = vmatpush1.bf16.msra.mxu0 %v829_v0  ;;  %v858_v0 = vunpack.c.h.s8.bf16 %v450_v60 }
  0xdf   : > { %1371 = vmatpush1.bf16.msra.mxu1 %v893_v1  ;;  %1329 = vmatprep.subr.bf16.mxu0 %v826_v2  ;;  %v922_v1 = vunpack.c.h.s8.bf16 %v482_v61  ;;  %v449_v2 = vld [vmem:[%s2586_s29 + $0x4a0] sm:$0xff] }
  0xe0   : > { %1372 = vmatprep.subr.bf16.mxu1 %v890_v3  ;;  %v481_v3 = vld [vmem:[%s2586_s29 + $0x5a0] sm:$0xff]  ;;  %v857_v4 = vunpack.c.h.s8.bf16 %v449_v2  ;;  %v853_v10 = vunpack.c.l.s8.bf16 %v449_v2 }
  0xe1   : > { %v921_v5 = vunpack.c.h.s8.bf16 %v481_v3  ;;  %v917_v11 = vunpack.c.l.s8.bf16 %v481_v3 }
  0xe2   : > { %1330 = vmatpush1.bf16.msra.mxu0 %v825_v6  ;;  %v854_v6 = vunpack.c.l.s8.bf16 %v450_v60  ;;  %v958_v60 = vunpack.c.l.s8.bf16 %v502_v40 }
  0xe3   : > { %1373 = vmatpush1.bf16.msra.mxu1 %v889_v7  ;;  %1331 = vmatprep.subr.bf16.mxu0 %v822_v8  ;;  %v918_v7 = vunpack.c.l.s8.bf16 %v482_v61  ;;  %v446_v8 = vld [vmem:[%s2586_s29 + $0x488] sm:$0xff] }
  0xe4   : > { %1374 = vmatprep.subr.bf16.mxu1 %v886_v9  ;;  %v478_v9 = vld [vmem:[%s2586_s29 + $0x588] sm:$0xff] }
  0xe6   : > { %1332 = vmatpush1.bf16.msra.mxu0 %v821_v12  ;;  %v850_v12 = vunpack.c.h.s8.bf16 %v446_v8 }
  0xe7   : > { %1375 = vmatpush1.bf16.msra.mxu1 %v885_v13  ;;  %1333 = vmatprep.subr.bf16.mxu0 %v818_v14  ;;  %v914_v13 = vunpack.c.h.s8.bf16 %v478_v9  ;;  %v445_v14 = vld [vmem:[%s2586_s29 + $0x480] sm:$0xff] }
  0xe8   : > { %1376 = vmatprep.subr.bf16.mxu1 %v882_v15  ;;  %v477_v15 = vld [vmem:[%s2586_s29 + $0x580] sm:$0xff]  ;;  %v849_v16 = vunpack.c.h.s8.bf16 %v445_v14  ;;  %v845_v22 = vunpack.c.l.s8.bf16 %v445_v14 }
  0xe9   : > { %v913_v17 = vunpack.c.h.s8.bf16 %v477_v15  ;;  %v909_v23 = vunpack.c.l.s8.bf16 %v477_v15 }
  0xea   : > { %1334 = vmatpush1.bf16.msra.mxu0 %v817_v18  ;;  %v846_v18 = vunpack.c.l.s8.bf16 %v446_v8 }
  0xeb   : > { %1377 = vmatpush1.bf16.msra.mxu1 %v881_v19  ;;  %1335 = vmatprep.subr.bf16.mxu0 %v814_v20  ;;  %v910_v19 = vunpack.c.l.s8.bf16 %v478_v9  ;;  %v506_v20 = vld [vmem:[%s2586_s29 + $0x668] sm:$0xff] }
  0xec   : > { %1378 = vmatprep.subr.bf16.mxu1 %v878_v21  ;;  %v538_v21 = vld [vmem:[%s2586_s29 + $0x768] sm:$0xff] }
  0xed   : > { %v1030_v36 = vunpack.c.l.s8.bf16 %v538_v21 }
  0xee   : > { %1336 = vmatpush1.bf16.msra.mxu0 %v813_v24  ;;  %v970_v24 = vunpack.c.h.s8.bf16 %v506_v20 }
  0xef   : > { %1379 = vmatpush1.bf16.msra.mxu1 %v877_v25  ;;  %1337 = vmatprep.subr.bf16.mxu0 %v874_v26  ;;  %v1034_v25 = vunpack.c.h.s8.bf16 %v538_v21  ;;  %v505_v26 = vld [vmem:[%s2586_s29 + $0x660] sm:$0xff] }
  0xf0   : > { %1380 = vmatprep.subr.bf16.mxu1 %v938_v27  ;;  %v537_v27 = vld [vmem:[%s2586_s29 + $0x760] sm:$0xff]  ;;  %v969_v46 = vunpack.c.h.s8.bf16 %v505_v26 }
  0xf1   : > { %v1033_v50 = vunpack.c.h.s8.bf16 %v537_v27 }
  0xf2   : > { %1338 = vmatpush2.bf16.msra.mxu0 %v873_v34  ;;  %v2774_v34 = vcombine.low %v2718_v42, %v2720_v43 }
  0xf3   : > { %1381 = vmatpush2.bf16.msra.mxu1 %v937_v35  ;;  %1339 = vmatprep.subr.bf16.mxu0 %v870_v44  ;;  %v2776_v35 = vld [vmem:[#allocation2 + $0x70] sm:$0xff]  ;;  %v2778_v44 = vld [vmem:[#allocation2 + $0x38] sm:$0xff] }
  0xf4   : > { %1382 = vmatprep.subr.bf16.mxu1 %v934_v45  ;;  %v2780_v45 = vld [vmem:[#allocation2 + $0x78] sm:$0xff]  ;;  %v2786_v42 = vcombine.high %v2766_v28, %v2776_v35 }
  0xf5   : > { %v2790_v43 = vcombine.high %v2778_v44, %v2780_v45 }
  0xf6   : > { %1340 = vmatpush2.bf16.msra.mxu0 %v869_v53  ;;  %v966_v53 = vunpack.c.l.s8.bf16 %v506_v20 }
  0xf7   : > { %1383 = vmatpush2.bf16.msra.mxu1 %v933_v47  ;;  %1341 = vmatprep.subr.bf16.mxu0 %v866_v48  ;;  %v534_v47 = vld [vmem:[%s2586_s29 + $0x748] sm:$0xff]  ;;  %v965_v48 = vunpack.c.l.s8.bf16 %v505_v26 }
  0xf8   : > { %1384 = vmatprep.subr.bf16.mxu1 %v930_v49  ;;  %v1029_v49 = vunpack.c.l.s8.bf16 %v537_v27  ;;  %v1026_v57 = vunpack.c.h.s8.bf16 %v534_v47  ;;  %v1022_v61 = vunpack.c.l.s8.bf16 %v534_v47 }
  0xfa   : > { %1342 = vmatpush2.bf16.msra.mxu0 %v865_v58  ;;  %v501_v58 = vld [vmem:[%s2586_s29 + $0x640] sm:$0xff] }
  0xfb   : > { %1385 = vmatpush2.bf16.msra.mxu1 %v929_v30  ;;  %1343 = vmatprep.subr.bf16.mxu0 %v862_v31  ;;  %v533_v30 = vld [vmem:[%s2586_s29 + $0x740] sm:$0xff]  ;;  %v961_v31 = vunpack.c.h.s8.bf16 %v501_v58 }
  0xfc   : > { %1386 = vmatprep.subr.bf16.mxu1 %v926_v59  ;;  %v1025_v59 = vunpack.c.h.s8.bf16 %v533_v30 }
  0xfe   : > { %1344 = vmatpush2.bf16.msra.mxu0 %v861_v62  ;;  %v498_v62 = vld [vmem:[%s2586_s29 + $0x628] sm:$0xff] }
  0xff   : > { %1387 = vmatpush2.bf16.msra.mxu1 %v925_v63  ;;  %1345 = vmatprep.subr.bf16.mxu0 %v858_v0  ;;  %v530_v63 = vld [vmem:[%s2586_s29 + $0x728] sm:$0xff]  ;;  %v957_v0 = vunpack.c.l.s8.bf16 %v501_v58  ;;  %v954_v2 = vunpack.c.h.s8.bf16 %v498_v62  ;;  %v950_v8 = vunpack.c.l.s8.bf16 %v498_v62 }
 0x100   : > { %1388 = vmatprep.subr.bf16.mxu1 %v922_v1  ;;  %v1021_v1 = vunpack.c.l.s8.bf16 %v533_v30  ;;  %v1018_v3 = vunpack.c.h.s8.bf16 %v530_v63  ;;  %v1014_v9 = vunpack.c.l.s8.bf16 %v530_v63 }
 0x102   : > { %1346 = vmatpush2.bf16.msra.mxu0 %v857_v4  ;;  %v497_v4 = vld [vmem:[%s2586_s29 + $0x620] sm:$0xff] }
 0x103   : > { %1389 = vmatpush2.bf16.msra.mxu1 %v921_v5  ;;  %1347 = vmatprep.subr.bf16.mxu0 %v854_v6  ;;  %v529_v5 = vld [vmem:[%s2586_s29 + $0x720] sm:$0xff]  ;;  %v953_v6 = vunpack.c.h.s8.bf16 %v497_v4 }
 0x104   : > { %1390 = vmatprep.subr.bf16.mxu1 %v918_v7  ;;  %v1017_v7 = vunpack.c.h.s8.bf16 %v529_v5 }
 0x106   : > { %1348 = vmatpush2.bf16.msra.mxu0 %v853_v10  ;;  %v494_v10 = vld [vmem:[%s2586_s29 + $0x608] sm:$0xff] }
 0x107   : > { %1391 = vmatpush2.bf16.msra.mxu1 %v917_v11  ;;  %1349 = vmatprep.subr.bf16.mxu0 %v850_v12  ;;  %v526_v11 = vld [vmem:[%s2586_s29 + $0x708] sm:$0xff]  ;;  %v949_v12 = vunpack.c.l.s8.bf16 %v497_v4  ;;  %v946_v14 = vunpack.c.h.s8.bf16 %v494_v10  ;;  %v942_v20 = vunpack.c.l.s8.bf16 %v494_v10 }
 0x108   : > { %1392 = vmatprep.subr.bf16.mxu1 %v914_v13  ;;  %v1013_v13 = vunpack.c.l.s8.bf16 %v529_v5  ;;  %v1010_v15 = vunpack.c.h.s8.bf16 %v526_v11  ;;  %v1006_v21 = vunpack.c.l.s8.bf16 %v526_v11 }
 0x10a   : > { %1350 = vmatpush2.bf16.msra.mxu0 %v849_v16  ;;  %v493_v16 = vld [vmem:[%s2586_s29 + $0x600] sm:$0xff] }
 0x10b   : > { %1393 = vmatpush2.bf16.msra.mxu1 %v913_v17  ;;  %1351 = vmatprep.subr.bf16.mxu0 %v846_v18  ;;  %v525_v17 = vld [vmem:[%s2586_s29 + $0x700] sm:$0xff]  ;;  %v945_v18 = vunpack.c.h.s8.bf16 %v493_v16 }
 0x10c   : > { %1394 = vmatprep.subr.bf16.mxu1 %v910_v19  ;;  %v1009_v19 = vunpack.c.h.s8.bf16 %v525_v17 }
 0x10e   : > { %1352 = vmatpush2.bf16.msra.mxu0 %v845_v22  ;;  %v522_v22 = vld [vmem:[%s2586_s29 + $0x6e8] sm:$0xff] }
 0x10f   : > { %1395 = vmatpush2.bf16.msra.mxu1 %v909_v23  ;;  %1407 = vmatprep.subr.bf16.mxu0 %v970_v24  ;;  %v554_v23 = vld [vmem:[%s2586_s29 + $0x7e8] sm:$0xff]  ;;  %v941_v24 = vunpack.c.l.s8.bf16 %v493_v16  ;;  %v1002_v26 = vunpack.c.h.s8.bf16 %v522_v22  ;;  %v998_v40 = vunpack.c.l.s8.bf16 %v522_v22 }
 0x110   : > { %1450 = vmatprep.subr.bf16.mxu1 %v1034_v25  ;;  %v1005_v25 = vunpack.c.l.s8.bf16 %v525_v17  ;;  %v1066_v27 = vunpack.c.h.s8.bf16 %v554_v23  ;;  %v1062_v47 = vunpack.c.l.s8.bf16 %v554_v23 }
 0x111   : > { %1354 = vmatmul.mubr.bf16.vlgmr.msra.gmra.mxu0 %v2770_v29 }
 0x112   : > { %1397 = vmatmul.mubr.bf16.vlgmr.msra.gmra.mxu1 %v2774_v34  ;;  %1408 = vmatpush1.bf16.msra.mxu0 %v969_v46  ;;  %v521_v46 = vld [vmem:[%s2586_s29 + $0x6e0] sm:$0xff] }
 0x113   : > { %1451 = vmatpush1.bf16.msra.mxu1 %v1033_v50  ;;  %1409 = vmatprep.subr.bf16.mxu0 %v966_v53  ;;  %v553_v50 = vld [vmem:[%s2586_s29 + $0x7e0] sm:$0xff]  ;;  %v1001_v53 = vunpack.c.h.s8.bf16 %v521_v46 }
 0x114   : > { %1452 = vmatprep.subr.bf16.mxu1 %v1030_v36  ;;  %1439 = vmatprep.mubr.bf16.mxu0 %v2786_v42  ;;  %v1065_v36 = vunpack.c.h.s8.bf16 %v553_v50 }
 0x115   : > { %1482 = vmatprep.mubr.bf16.mxu1 %v2790_v43 }
 0x116   : > { %1410 = vmatpush1.bf16.msra.mxu0 %v965_v48  ;;  %v518_v48 = vld [vmem:[%s2586_s29 + $0x6c8] sm:$0xff] }
 0x117   : > { %1453 = vmatpush1.bf16.msra.mxu1 %v1029_v49  ;;  %1411 = vmatprep.subr.bf16.mxu0 %v962_v56  ;;  %v550_v49 = vld [vmem:[%s2586_s29 + $0x7c8] sm:$0xff]  ;;  %v997_v56 = vunpack.c.l.s8.bf16 %v521_v46  ;;  %v994_v58 = vunpack.c.h.s8.bf16 %v518_v48  ;;  %v990_v62 = vunpack.c.l.s8.bf16 %v518_v48 }
 0x118   : > { %1454 = vmatprep.subr.bf16.mxu1 %v1026_v57  ;;  %v1061_v57 = vunpack.c.l.s8.bf16 %v553_v50  ;;  %v1058_v30 = vunpack.c.h.s8.bf16 %v550_v49  ;;  %v1054_v63 = vunpack.c.l.s8.bf16 %v550_v49 }
 0x11a   : > { %1412 = vmatpush1.bf16.msra.mxu0 %v961_v31  ;;  %v517_v31 = vld [vmem:[%s2586_s29 + $0x6c0] sm:$0xff] }
 0x11b   : > { %1455 = vmatpush1.bf16.msra.mxu1 %v1025_v59  ;;  %1413 = vmatprep.subr.bf16.mxu0 %v958_v60  ;;  %v549_v59 = vld [vmem:[%s2586_s29 + $0x7c0] sm:$0xff]  ;;  %v993_v60 = vunpack.c.h.s8.bf16 %v517_v31 }
 0x11c   : > { %1456 = vmatprep.subr.bf16.mxu1 %v1022_v61  ;;  %v1057_v61 = vunpack.c.h.s8.bf16 %v549_v59 }
 0x11e   : > { %1414 = vmatpush1.bf16.msra.mxu0 %v957_v0  ;;  %v514_v0 = vld [vmem:[%s2586_s29 + $0x6a8] sm:$0xff] }
 0x11f   : > { %1457 = vmatpush1.bf16.msra.mxu1 %v1021_v1  ;;  %1415 = vmatprep.subr.bf16.mxu0 %v954_v2  ;;  %v546_v1 = vld [vmem:[%s2586_s29 + $0x7a8] sm:$0xff]  ;;  %v989_v2 = vunpack.c.l.s8.bf16 %v517_v31  ;;  %v986_v4 = vunpack.c.h.s8.bf16 %v514_v0  ;;  %v982_v10 = vunpack.c.l.s8.bf16 %v514_v0  ;;  %v311_v31 = vld [vmem:[%s2586_s29 + $0x50] sm:$0xff]  ;;  %v308_v0 = vld [vmem:[%s2586_s29 + $0x38] sm:$0xff] }
 0x120   : > { %1458 = vmatprep.subr.bf16.mxu1 %v1018_v3  ;;  %v1053_v3 = vunpack.c.l.s8.bf16 %v549_v59  ;;  %v1050_v5 = vunpack.c.h.s8.bf16 %v546_v1  ;;  %v1046_v11 = vunpack.c.l.s8.bf16 %v546_v1  ;;  %v343_v59 = vld [vmem:[%s2586_s29 + $0x150] sm:$0xff]  ;;  %v340_v1 = vld [vmem:[%s2586_s29 + $0x138] sm:$0xff] }
 0x122   : > { %1416 = vmatpush1.bf16.msra.mxu0 %v953_v6  ;;  %v513_v6 = vld [vmem:[%s2586_s29 + $0x6a0] sm:$0xff] }
 0x123   : > { %1459 = vmatpush1.bf16.msra.mxu1 %v1017_v7  ;;  %1417 = vmatprep.subr.bf16.mxu0 %v950_v8  ;;  %v545_v7 = vld [vmem:[%s2586_s29 + $0x7a0] sm:$0xff]  ;;  %v985_v8 = vunpack.c.h.s8.bf16 %v513_v6 }
 0x124   : > { %1460 = vmatprep.subr.bf16.mxu1 %v1014_v9  ;;  %v1049_v9 = vunpack.c.h.s8.bf16 %v545_v7 }
 0x126   : > { %1418 = vmatpush1.bf16.msra.mxu0 %v949_v12  ;;  %v510_v12 = vld [vmem:[%s2586_s29 + $0x688] sm:$0xff] }
 0x127   : > { %1461 = vmatpush1.bf16.msra.mxu1 %v1013_v13  ;;  %1419 = vmatprep.subr.bf16.mxu0 %v946_v14  ;;  %v542_v13 = vld [vmem:[%s2586_s29 + $0x788] sm:$0xff]  ;;  %v981_v14 = vunpack.c.l.s8.bf16 %v513_v6  ;;  %v978_v16 = vunpack.c.h.s8.bf16 %v510_v12  ;;  %v974_v22 = vunpack.c.l.s8.bf16 %v510_v12 }
 0x128   : > { %1462 = vmatprep.subr.bf16.mxu1 %v1010_v15  ;;  %v1045_v15 = vunpack.c.l.s8.bf16 %v545_v7  ;;  %v1042_v17 = vunpack.c.h.s8.bf16 %v542_v13  ;;  %v1038_v23 = vunpack.c.l.s8.bf16 %v542_v13 }
 0x12a   : > { %1420 = vmatpush1.bf16.msra.mxu0 %v945_v18  ;;  %v509_v18 = vld [vmem:[%s2586_s29 + $0x680] sm:$0xff] }
 0x12b   : > { %1463 = vmatpush1.bf16.msra.mxu1 %v1009_v19  ;;  %1421 = vmatprep.subr.bf16.mxu0 %v942_v20  ;;  %v541_v19 = vld [vmem:[%s2586_s29 + $0x780] sm:$0xff]  ;;  %v977_v20 = vunpack.c.h.s8.bf16 %v509_v18 }
 0x12c   : > { %1464 = vmatprep.subr.bf16.mxu1 %v1006_v21  ;;  %v1041_v21 = vunpack.c.h.s8.bf16 %v541_v19 }
 0x12e   : > { %1422 = vmatpush1.bf16.msra.mxu0 %v941_v24  ;;  %v316_v24 = vld [vmem:[%s2586_s29 + $0x78] sm:$0xff] }
 0x12f   : > { %1465 = vmatpush1.bf16.msra.mxu1 %v1005_v25  ;;  %1423 = vmatprep.subr.bf16.mxu0 %v1002_v26  ;;  %v348_v25 = vld [vmem:[%s2586_s29 + $0x178] sm:$0xff]  ;;  %v973_v26 = vunpack.c.l.s8.bf16 %v509_v18  ;;  %v588_v46 = vunpack.c.h.s8.bf16 %v316_v24 }
 0x130   : > { %1466 = vmatprep.subr.bf16.mxu1 %v1066_v27  ;;  %v1037_v27 = vunpack.c.l.s8.bf16 %v541_v19  ;;  %v652_v50 = vunpack.c.h.s8.bf16 %v348_v25 }
 0x132   : > { %1424 = vmatpush2.bf16.msra.mxu0 %v1001_v53  ;;  %v315_v53 = vld [vmem:[%s2586_s29 + $0x70] sm:$0xff] }
 0x133   : > { %1467 = vmatpush2.bf16.msra.mxu1 %v1065_v36  ;;  %1425 = vmatprep.subr.bf16.mxu0 %v998_v40  ;;  %v347_v36 = vld [vmem:[%s2586_s29 + $0x170] sm:$0xff]  ;;  %v2828_v40 = vcombine.low %v2766_v28, %v2776_v35  ;;  %v587_v48 = vunpack.c.h.s8.bf16 %v315_v53  ;;  %v583_v28 = vunpack.c.l.s8.bf16 %v315_v53 }
 0x134   : > { %1468 = vmatprep.subr.bf16.mxu1 %v1062_v47  ;;  %v2832_v47 = vcombine.low %v2778_v44, %v2780_v45  ;;  %v651_v49 = vunpack.c.h.s8.bf16 %v347_v36  ;;  %v647_v35 = vunpack.c.l.s8.bf16 %v347_v36 }
 0x136   : > { %1426 = vmatpush2.bf16.msra.mxu0 %v997_v56  ;;  %v584_v56 = vunpack.c.l.s8.bf16 %v316_v24 }
 0x137   : > { %1469 = vmatpush2.bf16.msra.mxu1 %v1061_v57  ;;  %1427 = vmatprep.subr.bf16.mxu0 %v994_v58  ;;  %v648_v57 = vunpack.c.l.s8.bf16 %v348_v25  ;;  %v312_v58 = vld [vmem:[%s2586_s29 + $0x58] sm:$0xff] }
 0x138   : > { %1470 = vmatprep.subr.bf16.mxu1 %v1058_v30  ;;  %v344_v30 = vld [vmem:[%s2586_s29 + $0x158] sm:$0xff]  ;;  %v580_v44 = vunpack.c.h.s8.bf16 %v312_v58 }
 0x139   : > { %v644_v45 = vunpack.c.h.s8.bf16 %v344_v30 }
 0x13a   : > { %1428 = vmatpush2.bf16.msra.mxu0 %v993_v60  ;;  %v579_v60 = vunpack.c.h.s8.bf16 %v311_v31 }
 0x13b   : > { %1471 = vmatpush2.bf16.msra.mxu1 %v1057_v61  ;;  %1429 = vmatprep.subr.bf16.mxu0 %v990_v62  ;;  %v643_v61 = vunpack.c.h.s8.bf16 %v343_v59  ;;  %v576_v62 = vunpack.c.l.s8.bf16 %v312_v58 }
 0x13c   : > { %1472 = vmatprep.subr.bf16.mxu1 %v1054_v63  ;;  %v640_v63 = vunpack.c.l.s8.bf16 %v344_v30 }
 0x13e   : > { %1430 = vmatpush2.bf16.msra.mxu0 %v989_v2  ;;  %v575_v2 = vunpack.c.l.s8.bf16 %v311_v31 }
 0x13f   : > { %1473 = vmatpush2.bf16.msra.mxu1 %v1053_v3  ;;  %1431 = vmatprep.subr.bf16.mxu0 %v986_v4  ;;  %v639_v3 = vunpack.c.l.s8.bf16 %v343_v59  ;;  %v307_v4 = vld [vmem:[%s2586_s29 + $0x30] sm:$0xff] }
 0x140   : > { %1474 = vmatprep.subr.bf16.mxu1 %v1050_v5  ;;  %v339_v5 = vld [vmem:[%s2586_s29 + $0x130] sm:$0xff]  ;;  %v571_v6 = vunpack.c.h.s8.bf16 %v307_v4  ;;  %v567_v12 = vunpack.c.l.s8.bf16 %v307_v4 }
 0x141   : > { %v635_v7 = vunpack.c.h.s8.bf16 %v339_v5  ;;  %v631_v13 = vunpack.c.l.s8.bf16 %v339_v5 }
 0x142   : > { %1432 = vmatpush2.bf16.msra.mxu0 %v985_v8  ;;  %v568_v8 = vunpack.c.l.s8.bf16 %v308_v0 }
 0x143   : > { %1475 = vmatpush2.bf16.msra.mxu1 %v1049_v9  ;;  %1433 = vmatprep.subr.bf16.mxu0 %v982_v10  ;;  %v632_v9 = vunpack.c.l.s8.bf16 %v340_v1  ;;  %v304_v10 = vld [vmem:[%s2586_s29 + $0x18] sm:$0xff] }
 0x144   : > { %1476 = vmatprep.subr.bf16.mxu1 %v1046_v11  ;;  %v336_v11 = vld [vmem:[%s2586_s29 + $0x118] sm:$0xff] }
 0x146   : > { %1434 = vmatpush2.bf16.msra.mxu0 %v981_v14  ;;  %v564_v14 = vunpack.c.h.s8.bf16 %v304_v10 }
 0x147   : > { %1477 = vmatpush2.bf16.msra.mxu1 %v1045_v15  ;;  %1435 = vmatprep.subr.bf16.mxu0 %v978_v16  ;;  %v628_v15 = vunpack.c.h.s8.bf16 %v336_v11  ;;  %v303_v16 = vld [vmem:[%s2586_s29 + $0x10] sm:$0xff] }
 0x148   : > { %1478 = vmatprep.subr.bf16.mxu1 %v1042_v17  ;;  %v335_v17 = vld [vmem:[%s2586_s29 + $0x110] sm:$0xff]  ;;  %v563_v18 = vunpack.c.h.s8.bf16 %v303_v16  ;;  %v559_v24 = vunpack.c.l.s8.bf16 %v303_v16 }
 0x149   : > { %v627_v19 = vunpack.c.h.s8.bf16 %v335_v17  ;;  %v623_v25 = vunpack.c.l.s8.bf16 %v335_v17 }
 0x14a   : > { %1436 = vmatpush2.bf16.msra.mxu0 %v977_v20  ;;  %v560_v20 = vunpack.c.l.s8.bf16 %v304_v10 }
 0x14b   : > { %1479 = vmatpush2.bf16.msra.mxu1 %v1041_v21  ;;  %1437 = vmatprep.subr.bf16.mxu0 %v974_v22  ;;  %v624_v21 = vunpack.c.l.s8.bf16 %v336_v11  ;;  %v332_v22 = vld [vmem:[%s2586_s29 + $0xf8] sm:$0xff] }
 0x14c   : > { %1480 = vmatprep.subr.bf16.mxu1 %v1038_v23  ;;  %v364_v23 = vld [vmem:[%s2586_s29 + $0x1f8] sm:$0xff] }
 0x14e   : > { %1438 = vmatpush2.bf16.msra.mxu0 %v973_v26  ;;  %v620_v26 = vunpack.c.h.s8.bf16 %v332_v22 }
 0x14f   : > { %1481 = vmatpush2.bf16.msra.mxu1 %v1037_v27  ;;  %1493 = vmatprep.subr.bf16.mxu0 %v588_v46  ;;  %v684_v27 = vunpack.c.h.s8.bf16 %v364_v23  ;;  %v331_v46 = vld [vmem:[%s2586_s29 + $0xf0] sm:$0xff] }
 0x150   : > { %1536 = vmatprep.subr.bf16.mxu1 %v652_v50  ;;  %v363_v50 = vld [vmem:[%s2586_s29 + $0x1f0] sm:$0xff]  ;;  %v619_v53 = vunpack.c.h.s8.bf16 %v331_v46  ;;  %v615_v58 = vunpack.c.l.s8.bf16 %v331_v46 }
 0x151   : > { %1440 = vmatmul.mubr.bf16.vlgmr.msra.gmra.mxu0 %v2828_v40  ;;  %v683_v36 = vunpack.c.h.s8.bf16 %v363_v50  ;;  %v679_v30 = vunpack.c.l.s8.bf16 %v363_v50 }
 0x152   : > { %1483 = vmatmul.mubr.bf16.vlgmr.msra.gmra.mxu1 %v2832_v47  ;;  %1494 = vmatpush1.bf16.msra.mxu0 %v587_v48  ;;  %v616_v48 = vunpack.c.l.s8.bf16 %v332_v22 }
 0x153   : > { %1537 = vmatpush1.bf16.msra.mxu1 %v651_v49  ;;  %1495 = vmatprep.subr.bf16.mxu0 %v584_v56  ;;  %v680_v49 = vunpack.c.l.s8.bf16 %v364_v23  ;;  %v328_v56 = vld [vmem:[%s2586_s29 + $0xd8] sm:$0xff] }
 0x154   : > { %1538 = vmatprep.subr.bf16.mxu1 %v648_v57  ;;  %1525 = vmatprep.mubr.bf16.mxu0 %v2614_v38  ;;  %v572_v38 = vunpack.c.h.s8.bf16 %v308_v0  ;;  %v360_v57 = vld [vmem:[%s2586_s29 + $0x1d8] sm:$0xff] }
 0x155   : > { %1568 = vmatprep.mubr.bf16.mxu1 %v2620_v41  ;;  %v636_v41 = vunpack.c.h.s8.bf16 %v340_v1 }
 0x156   : > { %1496 = vmatpush1.bf16.msra.mxu0 %v583_v28  ;;  %v612_v28 = vunpack.c.h.s8.bf16 %v328_v56 }
 0x157   : > { %1539 = vmatpush1.bf16.msra.mxu1 %v647_v35  ;;  %1497 = vmatprep.subr.bf16.mxu0 %v580_v44  ;;  %v676_v35 = vunpack.c.h.s8.bf16 %v360_v57  ;;  %v327_v44 = vld [vmem:[%s2586_s29 + $0xd0] sm:$0xff] }
 0x158   : > { %1540 = vmatprep.subr.bf16.mxu1 %v644_v45  ;;  %v359_v45 = vld [vmem:[%s2586_s29 + $0x1d0] sm:$0xff]  ;;  %v611_v31 = vunpack.c.h.s8.bf16 %v327_v44  ;;  %v607_v0 = vunpack.c.l.s8.bf16 %v327_v44 }
 0x159   : > { %v675_v59 = vunpack.c.h.s8.bf16 %v359_v45  ;;  %v671_v1 = vunpack.c.l.s8.bf16 %v359_v45 }
 0x15a   : > { %1498 = vmatpush1.bf16.msra.mxu0 %v579_v60  ;;  %v608_v60 = vunpack.c.l.s8.bf16 %v328_v56 }
 0x15b   : > { %1541 = vmatpush1.bf16.msra.mxu1 %v643_v61  ;;  %1499 = vmatprep.subr.bf16.mxu0 %v576_v62  ;;  %v672_v61 = vunpack.c.l.s8.bf16 %v360_v57  ;;  %v324_v62 = vld [vmem:[%s2586_s29 + $0xb8] sm:$0xff] }
 0x15c   : > { %1542 = vmatprep.subr.bf16.mxu1 %v640_v63  ;;  %v356_v63 = vld [vmem:[%s2586_s29 + $0x1b8] sm:$0xff] }
 0x15e   : > { %1500 = vmatpush1.bf16.msra.mxu0 %v575_v2  ;;  %v604_v2 = vunpack.c.h.s8.bf16 %v324_v62 }
 0x15f   : > { %1543 = vmatpush1.bf16.msra.mxu1 %v639_v3  ;;  %1501 = vmatprep.subr.bf16.mxu0 %v572_v38  ;;  %v668_v3 = vunpack.c.h.s8.bf16 %v356_v63  ;;  %v323_v38 = vld [vmem:[%s2586_s29 + $0xb0] sm:$0xff] }
 0x160   : > { %1544 = vmatprep.subr.bf16.mxu1 %v636_v41  ;;  %v355_v41 = vld [vmem:[%s2586_s29 + $0x1b0] sm:$0xff]  ;;  %v603_v4 = vunpack.c.h.s8.bf16 %v323_v38  ;;  %v599_v10 = vunpack.c.l.s8.bf16 %v323_v38  ;;  %v368_v38 = vld [vmem:[%s2586_s29 + $0x218] sm:$0xff] }
 0x161   : > { %v667_v5 = vunpack.c.h.s8.bf16 %v355_v41  ;;  %v663_v11 = vunpack.c.l.s8.bf16 %v355_v41  ;;  %v400_v41 = vld [vmem:[%s2586_s29 + $0x318] sm:$0xff] }
 0x162   : > { %1502 = vmatpush1.bf16.msra.mxu0 %v571_v6  ;;  %v600_v6 = vunpack.c.l.s8.bf16 %v324_v62  ;;  %v371_v62 = vld [vmem:[%s2586_s29 + $0x230] sm:$0xff] }
 0x163   : > { %1545 = vmatpush1.bf16.msra.mxu1 %v635_v7  ;;  %1503 = vmatprep.subr.bf16.mxu0 %v568_v8  ;;  %v664_v7 = vunpack.c.l.s8.bf16 %v356_v63  ;;  %v320_v8 = vld [vmem:[%s2586_s29 + $0x98] sm:$0xff]  ;;  %v403_v63 = vld [vmem:[%s2586_s29 + $0x330] sm:$0xff] }
 0x164   : > { %1546 = vmatprep.subr.bf16.mxu1 %v632_v9  ;;  %v352_v9 = vld [vmem:[%s2586_s29 + $0x198] sm:$0xff] }
 0x166   : > { %1504 = vmatpush1.bf16.msra.mxu0 %v567_v12  ;;  %v596_v12 = vunpack.c.h.s8.bf16 %v320_v8 }
 0x167   : > { %1547 = vmatpush1.bf16.msra.mxu1 %v631_v13  ;;  %1505 = vmatprep.subr.bf16.mxu0 %v564_v14  ;;  %v660_v13 = vunpack.c.h.s8.bf16 %v352_v9  ;;  %v319_v14 = vld [vmem:[%s2586_s29 + $0x90] sm:$0xff] }
 0x168   : > { %1548 = vmatprep.subr.bf16.mxu1 %v628_v15  ;;  %v351_v15 = vld [vmem:[%s2586_s29 + $0x190] sm:$0xff]  ;;  %v595_v16 = vunpack.c.h.s8.bf16 %v319_v14  ;;  %v591_v22 = vunpack.c.l.s8.bf16 %v319_v14  ;;  %v396_v14 = vld [vmem:[%s2586_s29 + $0x2f8] sm:$0xff] }
 0x169   : > { %v659_v17 = vunpack.c.h.s8.bf16 %v351_v15  ;;  %v655_v23 = vunpack.c.l.s8.bf16 %v351_v15  ;;  %v428_v15 = vld [vmem:[%s2586_s29 + $0x3f8] sm:$0xff] }
 0x16a   : > { %1506 = vmatpush1.bf16.msra.mxu0 %v563_v18  ;;  %v592_v18 = vunpack.c.l.s8.bf16 %v320_v8  ;;  %v367_v8 = vld [vmem:[%s2586_s29 + $0x210] sm:$0xff] }
 0x16b   : > { %1549 = vmatpush1.bf16.msra.mxu1 %v627_v19  ;;  %1507 = vmatprep.subr.bf16.mxu0 %v560_v20  ;;  %v656_v19 = vunpack.c.l.s8.bf16 %v352_v9  ;;  %v380_v20 = vld [vmem:[%s2586_s29 + $0x278] sm:$0xff]  ;;  %v399_v9 = vld [vmem:[%s2586_s29 + $0x310] sm:$0xff] }
 0x16c   : > { %1550 = vmatprep.subr.bf16.mxu1 %v624_v21  ;;  %v412_v21 = vld [vmem:[%s2586_s29 + $0x378] sm:$0xff] }
 0x16e   : > { %1508 = vmatpush1.bf16.msra.mxu0 %v559_v24  ;;  %v716_v24 = vunpack.c.h.s8.bf16 %v380_v20 }
 0x16f   : > { %1551 = vmatpush1.bf16.msra.mxu1 %v623_v25  ;;  %1509 = vmatprep.subr.bf16.mxu0 %v620_v26  ;;  %v780_v25 = vunpack.c.h.s8.bf16 %v412_v21  ;;  %v379_v26 = vld [vmem:[%s2586_s29 + $0x270] sm:$0xff] }
 0x170   : > { %1552 = vmatprep.subr.bf16.mxu1 %v684_v27  ;;  %v411_v27 = vld [vmem:[%s2586_s29 + $0x370] sm:$0xff]  ;;  %v715_v46 = vunpack.c.h.s8.bf16 %v379_v26  ;;  %v711_v56 = vunpack.c.l.s8.bf16 %v379_v26  ;;  %v392_v26 = vld [vmem:[%s2586_s29 + $0x2d8] sm:$0xff] }
 0x171   : > { %v779_v50 = vunpack.c.h.s8.bf16 %v411_v27  ;;  %v775_v57 = vunpack.c.l.s8.bf16 %v411_v27  ;;  %v424_v27 = vld [vmem:[%s2586_s29 + $0x3d8] sm:$0xff] }
 0x172   : > { %1510 = vmatpush2.bf16.msra.mxu0 %v619_v53  ;;  %v712_v53 = vunpack.c.l.s8.bf16 %v380_v20  ;;  %v395_v20 = vld [vmem:[%s2586_s29 + $0x2f0] sm:$0xff] }
 0x173   : > { %1553 = vmatpush2.bf16.msra.mxu1 %v683_v36  ;;  %1511 = vmatprep.subr.bf16.mxu0 %v616_v48  ;;  %v776_v36 = vunpack.c.l.s8.bf16 %v412_v21  ;;  %v376_v48 = vld [vmem:[%s2586_s29 + $0x258] sm:$0xff]  ;;  %v427_v21 = vld [vmem:[%s2586_s29 + $0x3f0] sm:$0xff] }
 0x174   : > { %1554 = vmatprep.subr.bf16.mxu1 %v680_v49  ;;  %v408_v49 = vld [vmem:[%s2586_s29 + $0x358] sm:$0xff]  ;;  %v704_v44 = vunpack.c.l.s8.bf16 %v376_v48 }
 0x175   : > { %v768_v45 = vunpack.c.l.s8.bf16 %v408_v49 }
 0x176   : > { %1512 = vmatpush2.bf16.msra.mxu0 %v615_v58  ;;  %v708_v58 = vunpack.c.h.s8.bf16 %v376_v48  ;;  %v391_v48 = vld [vmem:[%s2586_s29 + $0x2d0] sm:$0xff] }
 0x177   : > { %1555 = vmatpush2.bf16.msra.mxu1 %v679_v30  ;;  %1513 = vmatprep.subr.bf16.mxu0 %v612_v28  ;;  %v772_v30 = vunpack.c.h.s8.bf16 %v408_v49  ;;  %v375_v28 = vld [vmem:[%s2586_s29 + $0x250] sm:$0xff] }
 0x178   : > { %1556 = vmatprep.subr.bf16.mxu1 %v676_v35  ;;  %v407_v35 = vld [vmem:[%s2586_s29 + $0x350] sm:$0xff] }
 0x179   : > { %v423_v49 = vld [vmem:[%s2586_s29 + $0x3d0] sm:$0xff] }
 0x17a   : > { %1514 = vmatpush2.bf16.msra.mxu0 %v611_v31  ;;  %v372_v31 = vld [vmem:[%s2586_s29 + $0x238] sm:$0xff] }
 0x17b   : > { %1557 = vmatpush2.bf16.msra.mxu1 %v675_v59  ;;  %1515 = vmatprep.subr.bf16.mxu0 %v608_v60  ;;  %v404_v59 = vld [vmem:[%s2586_s29 + $0x338] sm:$0xff]  ;;  %v703_v60 = vunpack.c.l.s8.bf16 %v375_v28 }
 0x17c   : > { %1558 = vmatprep.subr.bf16.mxu1 %v672_v61  ;;  %v767_v61 = vunpack.c.l.s8.bf16 %v407_v35 }
 0x17e   : > { %1516 = vmatpush2.bf16.msra.mxu0 %v607_v0  ;;  %v699_v0 = vunpack.c.h.s8.bf16 %v371_v62 }
 0x17f   : > { %1559 = vmatpush2.bf16.msra.mxu1 %v671_v1  ;;  %1517 = vmatprep.subr.bf16.mxu0 %v604_v2  ;;  %v763_v1 = vunpack.c.h.s8.bf16 %v403_v63  ;;  %v696_v2 = vunpack.c.l.s8.bf16 %v372_v31 }
 0x180   : > { %1560 = vmatprep.subr.bf16.mxu1 %v668_v3  ;;  %v760_v3 = vunpack.c.l.s8.bf16 %v404_v59 }
 0x182   : > { %1518 = vmatpush2.bf16.msra.mxu0 %v603_v4  ;;  %v695_v4 = vunpack.c.l.s8.bf16 %v371_v62  ;;  %v384_v62 = vld [vmem:[%s2586_s29 + $0x298] sm:$0xff] }
 0x183   : > { %1561 = vmatpush2.bf16.msra.mxu1 %v667_v5  ;;  %1519 = vmatprep.subr.bf16.mxu0 %v600_v6  ;;  %v759_v5 = vunpack.c.l.s8.bf16 %v403_v63  ;;  %v692_v6 = vunpack.c.h.s8.bf16 %v368_v38  ;;  %v416_v63 = vld [vmem:[%s2586_s29 + $0x398] sm:$0xff] }
 0x184   : > { %1562 = vmatprep.subr.bf16.mxu1 %v664_v7  ;;  %v756_v7 = vunpack.c.h.s8.bf16 %v400_v41 }
 0x186   : > { %1520 = vmatpush2.bf16.msra.mxu0 %v599_v10  ;;  %v691_v10 = vunpack.c.h.s8.bf16 %v367_v8 }
 0x187   : > { %1563 = vmatpush2.bf16.msra.mxu1 %v663_v11  ;;  %1521 = vmatprep.subr.bf16.mxu0 %v596_v12  ;;  %v755_v11 = vunpack.c.h.s8.bf16 %v399_v9  ;;  %v688_v12 = vunpack.c.l.s8.bf16 %v368_v38  ;;  %v383_v38 = vld [vmem:[%s2586_s29 + $0x290] sm:$0xff] }
 0x188   : > { %1564 = vmatprep.subr.bf16.mxu1 %v660_v13  ;;  %v752_v13 = vunpack.c.l.s8.bf16 %v400_v41  ;;  %v415_v41 = vld [vmem:[%s2586_s29 + $0x390] sm:$0xff] }
 0x18a   : > { %1522 = vmatpush2.bf16.msra.mxu0 %v595_v16  ;;  %v687_v16 = vunpack.c.l.s8.bf16 %v367_v8  ;;  %v444_v8 = vld [vmem:[%s2586_s29 + $0x478] sm:$0xff] }
 0x18b   : > { %1565 = vmatpush2.bf16.msra.mxu1 %v659_v17  ;;  %1523 = vmatprep.subr.bf16.mxu0 %v592_v18  ;;  %v751_v17 = vunpack.c.l.s8.bf16 %v399_v9  ;;  %v748_v18 = vunpack.c.h.s8.bf16 %v396_v14  ;;  %v476_v9 = vld [vmem:[%s2586_s29 + $0x578] sm:$0xff] }
 0x18c   : > { %1566 = vmatprep.subr.bf16.mxu1 %v656_v19  ;;  %v812_v19 = vunpack.c.h.s8.bf16 %v428_v15 }
 0x18e   : > { %1524 = vmatpush2.bf16.msra.mxu0 %v591_v22  ;;  %v747_v22 = vunpack.c.h.s8.bf16 %v395_v20 }
 0x18f   : > { %1567 = vmatpush2.bf16.msra.mxu1 %v655_v23  ;;  %1579 = vmatprep.subr.bf16.mxu0 %v716_v24  ;;  %v811_v23 = vunpack.c.h.s8.bf16 %v427_v21  ;;  %v744_v24 = vunpack.c.l.s8.bf16 %v396_v14  ;;  %v443_v14 = vld [vmem:[%s2586_s29 + $0x470] sm:$0xff] }
 0x190   : > { %1622 = vmatprep.subr.bf16.mxu1 %v780_v25  ;;  %v808_v25 = vunpack.c.l.s8.bf16 %v428_v15  ;;  %v475_v15 = vld [vmem:[%s2586_s29 + $0x570] sm:$0xff] }
 0x191   : > { %1526 = vmatmul.mubr.bf16.vlgmr.msra.gmra.mxu0 %v2650_v51  ;;  %v707_v51 = vunpack.c.h.s8.bf16 %v375_v28  ;;  %v388_v28 = vld [vmem:[%s2586_s29 + $0x2b8] sm:$0xff] }
 0x192   : > { %1569 = vmatmul.mubr.bf16.vlgmr.msra.gmra.mxu1 %v2654_v52  ;;  %1580 = vmatpush1.bf16.msra.mxu0 %v715_v46  ;;  %v771_v52 = vunpack.c.h.s8.bf16 %v407_v35  ;;  %v743_v46 = vunpack.c.l.s8.bf16 %v395_v20  ;;  %v420_v35 = vld [vmem:[%s2586_s29 + $0x3b8] sm:$0xff] }
 0x193   : > { %1623 = vmatpush1.bf16.msra.mxu1 %v779_v50  ;;  %1581 = vmatprep.subr.bf16.mxu0 %v712_v53  ;;  %v807_v50 = vunpack.c.l.s8.bf16 %v427_v21  ;;  %v740_v53 = vunpack.c.h.s8.bf16 %v392_v26  ;;  %v440_v20 = vld [vmem:[%s2586_s29 + $0x458] sm:$0xff] }
 0x194   : > { %1624 = vmatprep.subr.bf16.mxu1 %v776_v36  ;;  %1611 = vmatprep.mubr.bf16.mxu0 %v2666_v32  ;;  %v700_v32 = vunpack.c.h.s8.bf16 %v372_v31  ;;  %v804_v36 = vunpack.c.h.s8.bf16 %v424_v27  ;;  %v387_v31 = vld [vmem:[%s2586_s29 + $0x2b0] sm:$0xff]  ;;  %v472_v21 = vld [vmem:[%s2586_s29 + $0x558] sm:$0xff] }
 0x195   : > { %1654 = vmatprep.mubr.bf16.mxu1 %v2670_v33  ;;  %v764_v33 = vunpack.c.h.s8.bf16 %v404_v59  ;;  %v419_v59 = vld [vmem:[%s2586_s29 + $0x3b0] sm:$0xff] }
 0x196   : > { %1582 = vmatpush1.bf16.msra.mxu0 %v711_v56  ;;  %v739_v56 = vunpack.c.h.s8.bf16 %v391_v48 }
 0x197   : > { %1625 = vmatpush1.bf16.msra.mxu1 %v775_v57  ;;  %1583 = vmatprep.subr.bf16.mxu0 %v708_v58  ;;  %v803_v57 = vunpack.c.h.s8.bf16 %v423_v49  ;;  %v736_v58 = vunpack.c.l.s8.bf16 %v392_v26  ;;  %v439_v26 = vld [vmem:[%s2586_s29 + $0x450] sm:$0xff] }
 0x198   : > { %1626 = vmatprep.subr.bf16.mxu1 %v772_v30  ;;  %v800_v30 = vunpack.c.l.s8.bf16 %v424_v27  ;;  %v471_v27 = vld [vmem:[%s2586_s29 + $0x550] sm:$0xff] }
 0x19a   : > { %1584 = vmatpush1.bf16.msra.mxu0 %v707_v51  ;;  %v735_v51 = vunpack.c.l.s8.bf16 %v391_v48  ;;  %v831_v48 = vunpack.c.l.s8.bf16 %v439_v26 }
 0x19b   : > { %1627 = vmatpush1.bf16.msra.mxu1 %v771_v52  ;;  %1585 = vmatprep.subr.bf16.mxu0 %v704_v44  ;;  %v799_v52 = vunpack.c.l.s8.bf16 %v423_v49  ;;  %v732_v44 = vunpack.c.h.s8.bf16 %v388_v28  ;;  %v895_v49 = vunpack.c.l.s8.bf16 %v471_v27 }
 0x19c   : > { %1628 = vmatprep.subr.bf16.mxu1 %v768_v45  ;;  %v796_v45 = vunpack.c.h.s8.bf16 %v420_v35 }
 0x19e   : > { %1586 = vmatpush1.bf16.msra.mxu0 %v703_v60  ;;  %v731_v60 = vunpack.c.h.s8.bf16 %v387_v31 }
 0x19f   : > { %1629 = vmatpush1.bf16.msra.mxu1 %v767_v61  ;;  %1587 = vmatprep.subr.bf16.mxu0 %v700_v32  ;;  %v795_v61 = vunpack.c.h.s8.bf16 %v419_v59  ;;  %v728_v32 = vunpack.c.l.s8.bf16 %v388_v28 }
 0x1a0   : > { %1630 = vmatprep.subr.bf16.mxu1 %v764_v33  ;;  %v792_v33 = vunpack.c.l.s8.bf16 %v420_v35 }
 0x1a2   : > { %1588 = vmatpush1.bf16.msra.mxu0 %v699_v0  ;;  %v727_v0 = vunpack.c.l.s8.bf16 %v387_v31 }
 0x1a3   : > { %1631 = vmatpush1.bf16.msra.mxu1 %v763_v1  ;;  %1589 = vmatprep.subr.bf16.mxu0 %v696_v2  ;;  %v791_v1 = vunpack.c.l.s8.bf16 %v419_v59  ;;  %v724_v2 = vunpack.c.h.s8.bf16 %v384_v62 }
 0x1a4   : > { %1632 = vmatprep.subr.bf16.mxu1 %v760_v3  ;;  %v788_v3 = vunpack.c.h.s8.bf16 %v416_v63 }
 0x1a6   : > { %1590 = vmatpush1.bf16.msra.mxu0 %v695_v4  ;;  %v723_v4 = vunpack.c.h.s8.bf16 %v383_v38 }
 0x1a7   : > { %1633 = vmatpush1.bf16.msra.mxu1 %v759_v5  ;;  %1591 = vmatprep.subr.bf16.mxu0 %v692_v6  ;;  %v787_v5 = vunpack.c.h.s8.bf16 %v415_v41  ;;  %v720_v6 = vunpack.c.l.s8.bf16 %v384_v62 }
 0x1a8   : > { %1634 = vmatprep.subr.bf16.mxu1 %v756_v7  ;;  %v784_v7 = vunpack.c.l.s8.bf16 %v416_v63  ;;  %v2924_v63 = vpop.f32.mrf.mxu1 }
 0x1aa   : > { %1592 = vmatpush1.bf16.msra.mxu0 %v691_v10  ;;  %v719_v10 = vunpack.c.l.s8.bf16 %v383_v38 }
 0x1ab   : > { %1635 = vmatpush1.bf16.msra.mxu1 %v755_v11  ;;  %1593 = vmatprep.subr.bf16.mxu0 %v688_v12  ;;  %v783_v11 = vunpack.c.l.s8.bf16 %v415_v41  ;;  %v844_v12 = vunpack.c.h.s8.bf16 %v444_v8 }
 0x1ac   : > { %1636 = vmatprep.subr.bf16.mxu1 %v752_v13  ;;  %v908_v13 = vunpack.c.h.s8.bf16 %v476_v9 }
 0x1ae   : > { %1594 = vmatpush1.bf16.msra.mxu0 %v687_v16  ;;  %v843_v16 = vunpack.c.h.s8.bf16 %v443_v14 }
 0x1af   : > { %1637 = vmatpush1.bf16.msra.mxu1 %v751_v17  ;;  %1595 = vmatprep.subr.bf16.mxu0 %v748_v18  ;;  %v907_v17 = vunpack.c.h.s8.bf16 %v475_v15  ;;  %v840_v18 = vunpack.c.l.s8.bf16 %v444_v8  ;;  %v459_v8 = vld [vmem:[%s2586_s29 + $0x4f0] sm:$0xff] }
 0x1b0   : > { %1638 = vmatprep.subr.bf16.mxu1 %v812_v19  ;;  %v904_v19 = vunpack.c.l.s8.bf16 %v476_v9  ;;  %v491_v9 = vld [vmem:[%s2586_s29 + $0x5f0] sm:$0xff] }
 0x1b2   : > { %1596 = vmatpush2.bf16.msra.mxu0 %v747_v22  ;;  %v839_v22 = vunpack.c.l.s8.bf16 %v443_v14 }
 0x1b3   : > { %1639 = vmatpush2.bf16.msra.mxu1 %v811_v23  ;;  %1597 = vmatprep.subr.bf16.mxu0 %v744_v24  ;;  %v903_v23 = vunpack.c.l.s8.bf16 %v475_v15  ;;  %v836_v24 = vunpack.c.h.s8.bf16 %v440_v20 }
 0x1b4   : > { %1640 = vmatprep.subr.bf16.mxu1 %v808_v25  ;;  %v900_v25 = vunpack.c.h.s8.bf16 %v472_v21 }
 0x1b6   : > { %1598 = vmatpush2.bf16.msra.mxu0 %v743_v46  ;;  %v832_v46 = vunpack.c.l.s8.bf16 %v440_v20  ;;  %v935_v20 = vunpack.c.l.s8.bf16 %v491_v9 }
 0x1b7   : > { %1641 = vmatpush2.bf16.msra.mxu1 %v807_v50  ;;  %1599 = vmatprep.subr.bf16.mxu0 %v740_v53  ;;  %v896_v50 = vunpack.c.l.s8.bf16 %v472_v21  ;;  %v436_v53 = vld [vmem:[%s2586_s29 + $0x438] sm:$0xff] }
 0x1b8   : > { %1642 = vmatprep.subr.bf16.mxu1 %v804_v36  ;;  %v468_v36 = vld [vmem:[%s2586_s29 + $0x538] sm:$0xff]  ;;  %v824_v28 = vunpack.c.l.s8.bf16 %v436_v53 }
 0x1b9   : > { %v888_v35 = vunpack.c.l.s8.bf16 %v468_v36 }
 0x1ba   : > { %1600 = vmatpush2.bf16.msra.mxu0 %v739_v56  ;;  %v435_v56 = vld [vmem:[%s2586_s29 + $0x430] sm:$0xff] }
 0x1bb   : > { %1643 = vmatpush2.bf16.msra.mxu1 %v803_v57  ;;  %1601 = vmatprep.subr.bf16.mxu0 %v736_v58  ;;  %v467_v57 = vld [vmem:[%s2586_s29 + $0x530] sm:$0xff]  ;;  %v827_v58 = vunpack.c.h.s8.bf16 %v435_v56 }
 0x1bc   : > { %1644 = vmatprep.subr.bf16.mxu1 %v800_v30  ;;  %v891_v30 = vunpack.c.h.s8.bf16 %v467_v57 }
 0x1be   : > { %1602 = vmatpush2.bf16.msra.mxu0 %v735_v51  ;;  %v432_v51 = vld [vmem:[%s2586_s29 + $0x418] sm:$0xff] }
 0x1bf   : > { %1645 = vmatpush2.bf16.msra.mxu1 %v799_v52  ;;  %1603 = vmatprep.subr.bf16.mxu0 %v732_v44  ;;  %v464_v52 = vld [vmem:[%s2586_s29 + $0x518] sm:$0xff]  ;;  %v823_v44 = vunpack.c.l.s8.bf16 %v435_v56  ;;  %v820_v31 = vunpack.c.h.s8.bf16 %v432_v51 }
 0x1c0   : > { %1646 = vmatprep.subr.bf16.mxu1 %v796_v45  ;;  %v887_v45 = vunpack.c.l.s8.bf16 %v467_v57  ;;  %v884_v59 = vunpack.c.h.s8.bf16 %v464_v52 }
 0x1c2   : > { %1604 = vmatpush2.bf16.msra.mxu0 %v731_v60  ;;  %v431_v60 = vld [vmem:[%s2586_s29 + $0x410] sm:$0xff] }
 0x1c3   : > { %1647 = vmatpush2.bf16.msra.mxu1 %v795_v61  ;;  %1605 = vmatprep.subr.bf16.mxu0 %v728_v32  ;;  %v463_v61 = vld [vmem:[%s2586_s29 + $0x510] sm:$0xff]  ;;  %v2922_v32 = vpop.f32.mrf.mxu0  ;;  %v815_v41 = vunpack.c.l.s8.bf16 %v431_v60 }
 0x1c4   : > { %1648 = vmatprep.subr.bf16.mxu1 %v792_v33  ;;  %v819_v33 = vunpack.c.h.s8.bf16 %v431_v60  ;;  %v883_v62 = vunpack.c.h.s8.bf16 %v463_v61  ;;  %v480_v60 = vld [vmem:[%s2586_s29 + $0x598] sm:$0xff] }
 0x1c5   : > { %v2928_v38 = vpop.f32.mrf.mxu0 }
 0x1c6   : > { %1606 = vmatpush2.bf16.msra.mxu0 %v727_v0  ;;  %v816_v0 = vunpack.c.l.s8.bf16 %v432_v51 }
 0x1c7   : > { %1649 = vmatpush2.bf16.msra.mxu1 %v791_v1  ;;  %1607 = vmatprep.subr.bf16.mxu0 %v724_v2  ;;  %v880_v1 = vunpack.c.l.s8.bf16 %v464_v52  ;;  %v460_v2 = vld [vmem:[%s2586_s29 + $0x4f8] sm:$0xff] }
 0x1c8   : > { %1650 = vmatprep.subr.bf16.mxu1 %v788_v3  ;;  %v492_v3 = vld [vmem:[%s2586_s29 + $0x5f8] sm:$0xff]  ;;  %v872_v14 = vunpack.c.l.s8.bf16 %v460_v2 }
 0x1c9   : > { %v936_v15 = vunpack.c.l.s8.bf16 %v492_v3 }
 0x1ca   : > { %1608 = vmatpush2.bf16.msra.mxu0 %v723_v4  ;;  %v879_v4 = vunpack.c.l.s8.bf16 %v463_v61 }
 0x1cb   : > { %1651 = vmatpush2.bf16.msra.mxu1 %v787_v5  ;;  %1609 = vmatprep.subr.bf16.mxu0 %v720_v6  ;;  %v2930_v5 = vpop.f32.mrf.mxu1  ;;  %v876_v6 = vunpack.c.h.s8.bf16 %v460_v2 }
 0x1cc   : > { %1652 = vmatprep.subr.bf16.mxu1 %v784_v7  ;;  %v940_v7 = vunpack.c.h.s8.bf16 %v492_v3  ;;  %v916_v3 = vunpack.c.h.s8.bf16 %v480_v60 }
 0x1ce   : > { %1610 = vmatpush2.bf16.msra.mxu0 %v719_v10  ;;  %v2934_v10 = vpop.f32.mrf.mxu0 }
 0x1cf   : > { %1653 = vmatpush2.bf16.msra.mxu1 %v783_v11  ;;  %1665 = vmatprep.subr.bf16.mxu0 %v844_v12  ;;  %v875_v11 = vunpack.c.h.s8.bf16 %v459_v8  ;;  %v939_v12 = vunpack.c.h.s8.bf16 %v491_v9 }
 0x1d0   : > { %1708 = vmatprep.subr.bf16.mxu1 %v908_v13  ;;  %v2936_v13 = vpop.f32.mrf.mxu1 }
 0x1d1   : > { %1612 = vmatmul.mubr.bf16.vlgmr.msra.gmra.mxu0 %v2710_v37  ;;  %v835_v37 = vunpack.c.h.s8.bf16 %v439_v26 }
 0x1d2   : > { %1655 = vmatmul.mubr.bf16.vlgmr.msra.gmra.mxu1 %v2714_v39  ;;  %1666 = vmatpush1.bf16.msra.mxu0 %v843_v16  ;;  %v899_v39 = vunpack.c.h.s8.bf16 %v471_v27  ;;  %v456_v16 = vld [vmem:[%s2586_s29 + $0x4d8] sm:$0xff]  ;;  %v2942_v21 = vpop.f32.mrf.mxu1 }
 0x1d3   : > { %1709 = vmatpush1.bf16.msra.mxu1 %v907_v17  ;;  %1667 = vmatprep.subr.bf16.mxu0 %v840_v18  ;;  %v488_v17 = vld [vmem:[%s2586_s29 + $0x5d8] sm:$0xff]  ;;  %v2940_v18 = vpop.f32.mrf.mxu0 }
 0x1d4   : > { %1710 = vmatprep.subr.bf16.mxu1 %v904_v19  ;;  %1697 = vmatprep.mubr.bf16.mxu0 %v2726_v54  ;;  %v828_v54 = vunpack.c.h.s8.bf16 %v436_v53  ;;  %v871_v19 = vunpack.c.l.s8.bf16 %v459_v8  ;;  %v2946_v27 = vpop.f32.mrf.mxu1  ;;  %v1229_v8 = vadd.f32 %v2930_v5, %v2928_v38  ;;  %v1233_v38 = vadd.f32 %v2942_v21, %v2940_v18  ;;  %v2978_v18 = vld [vmem:[%s2586_s29 + $0x770] sm:$0xff] }
 0x1d5   : > { %1740 = vmatprep.mubr.bf16.mxu1 %v2730_v55  ;;  %v892_v55 = vunpack.c.h.s8.bf16 %v468_v36  ;;  %v1269_v26 = vpop.f32.mrf.mxu0  ;;  %v452_v36 = vld [vmem:[%s2586_s29 + $0x4b8] sm:$0xff] }
 0x1d6   : > { %1668 = vmatpush1.bf16.msra.mxu0 %v839_v22  ;;  %v868_v22 = vunpack.c.h.s8.bf16 %v456_v16  ;;  %v860_v56 = vunpack.c.h.s8.bf16 %v452_v36 }
 0x1d7   : > { %1711 = vmatpush1.bf16.msra.mxu1 %v903_v23  ;;  %1669 = vmatprep.subr.bf16.mxu0 %v836_v24  ;;  %v932_v23 = vunpack.c.h.s8.bf16 %v488_v17  ;;  %v455_v24 = vld [vmem:[%s2586_s29 + $0x4d0] sm:$0xff]  ;;  %v1271_v53 = vpop.f32.mrf.mxu0 }
 0x1d8   : > { %1712 = vmatprep.subr.bf16.mxu1 %v900_v25  ;;  %v487_v25 = vld [vmem:[%s2586_s29 + $0x5d0] sm:$0xff] }
 0x1da   : > { %1670 = vmatpush1.bf16.msra.mxu0 %v835_v37  ;;  %v867_v37 = vunpack.c.h.s8.bf16 %v455_v24 }
 0x1db   : > { %1713 = vmatpush1.bf16.msra.mxu1 %v899_v39  ;;  %1671 = vmatprep.subr.bf16.mxu0 %v832_v46  ;;  %v931_v39 = vunpack.c.h.s8.bf16 %v487_v25  ;;  %v864_v46 = vunpack.c.l.s8.bf16 %v456_v16 }
 0x1dc   : > { %1714 = vmatprep.subr.bf16.mxu1 %v896_v50  ;;  %v928_v50 = vunpack.c.l.s8.bf16 %v488_v17  ;;  %v912_v17 = vunpack.c.l.s8.bf16 %v480_v60 }
 0x1de   : > { %1672 = vmatpush1.bf16.msra.mxu0 %v831_v48  ;;  %v484_v48 = vld [vmem:[%s2586_s29 + $0x5b8] sm:$0xff] }
 0x1df   : > { %1715 = vmatpush1.bf16.msra.mxu1 %v895_v49  ;;  %1673 = vmatprep.subr.bf16.mxu0 %v828_v54  ;;  %v2950_v49 = vpop.f32.mrf.mxu1  ;;  %v863_v54 = vunpack.c.l.s8.bf16 %v455_v24  ;;  %v924_v57 = vunpack.c.h.s8.bf16 %v484_v48 }
 0x1e0   : > { %1716 = vmatprep.subr.bf16.mxu1 %v892_v55  ;;  %v927_v55 = vunpack.c.l.s8.bf16 %v487_v25 }
 0x1e2   : > { %1674 = vmatpush1.bf16.msra.mxu0 %v827_v58  ;;  %v451_v58 = vld [vmem:[%s2586_s29 + $0x4b0] sm:$0xff] }
 0x1e3   : > { %1717 = vmatpush1.bf16.msra.mxu1 %v891_v30  ;;  %1675 = vmatprep.subr.bf16.mxu0 %v824_v28  ;;  %v483_v30 = vld [vmem:[%s2586_s29 + $0x5b0] sm:$0xff]  ;;  %v1273_v28 = vpop.f32.mrf.mxu0  ;;  %v859_v51 = vunpack.c.h.s8.bf16 %v451_v58 }
 0x1e4   : > { %1718 = vmatprep.subr.bf16.mxu1 %v888_v35  ;;  %v2954_v35 = vpop.f32.mrf.mxu1  ;;  %v923_v52 = vunpack.c.h.s8.bf16 %v483_v30 }
 0x1e6   : > { %1676 = vmatpush1.bf16.msra.mxu0 %v823_v44  ;;  %v856_v44 = vunpack.c.l.s8.bf16 %v452_v36  ;;  %v1318_v61 = vpop.f32.mrf.mxu1 }
 0x1e7   : > { %1719 = vmatpush1.bf16.msra.mxu1 %v887_v45  ;;  %1677 = vmatprep.subr.bf16.mxu0 %v820_v31  ;;  %v920_v45 = vunpack.c.l.s8.bf16 %v484_v48  ;;  %v1275_v31 = vpop.f32.mrf.mxu0 }
 0x1e8   : > { %1720 = vmatprep.subr.bf16.mxu1 %v884_v59  ;;  %v448_v59 = vld [vmem:[%s2586_s29 + $0x498] sm:$0xff] }
 0x1e9   : > { %v852_v2 = vunpack.c.h.s8.bf16 %v448_v59  ;;  %v848_v16 = vunpack.c.l.s8.bf16 %v448_v59 }
 0x1ea   : > { %1678 = vmatpush1.bf16.msra.mxu0 %v819_v33  ;;  %v1355_v33 = vpop.f32.mrf.mxu0 }
 0x1eb   : > { %1721 = vmatpush1.bf16.msra.mxu1 %v883_v62  ;;  %1679 = vmatprep.subr.bf16.mxu0 %v816_v0  ;;  %v855_v62 = vunpack.c.l.s8.bf16 %v451_v58  ;;  %v919_v0 = vunpack.c.l.s8.bf16 %v483_v30 }
 0x1ec   : > { %1722 = vmatprep.subr.bf16.mxu1 %v880_v1  ;;  %v1398_v1 = vpop.f32.mrf.mxu1 }
 0x1ee   : > { %1680 = vmatpush1.bf16.msra.mxu0 %v815_v41  ;;  %v447_v41 = vld [vmem:[%s2586_s29 + $0x490] sm:$0xff] }
 0x1ef   : > { %1723 = vmatpush1.bf16.msra.mxu1 %v879_v4  ;;  %1681 = vmatprep.subr.bf16.mxu0 %v876_v6  ;;  %v479_v4 = vld [vmem:[%s2586_s29 + $0x590] sm:$0xff]  ;;  %v1227_v6 = vadd.f32 %v2924_v63, %v2922_v32  ;;  %v1231_v32 = vadd.f32 %v2936_v13, %v2934_v10  ;;  %v1272_v63 = vadd.f32 %v1271_v53, %v1229_v8  ;;  %v847_v25 = vunpack.c.l.s8.bf16 %v447_v41 }
 0x1f0   : > { %1724 = vmatprep.subr.bf16.mxu1 %v940_v7  ;;  %v1840_v7 = vlaneseq  ;;  %v1276_v10 = vadd.f32 %v1275_v31, %v1233_v38  ;;  %v535_v8 = vld [vmem:[%s2586_s29 + $0x750] sm:$0xff] }
 0x1f1   : > { %v1270_v9 = vadd.f32 %v1269_v26, %v1227_v6  ;;  %v911_v26 = vunpack.c.l.s8.bf16 %v479_v4  ;;  %v1315_v21 = vadd.f32 %v2950_v49, %v1272_v63 }
 0x1f2   : > { %1682 = vmatpush2.bf16.msra.mxu0 %v875_v11  ;;  %v1357_v11 = vpop.f32.mrf.mxu0  ;;  %v2971_v5 = vshrl.u32 %v1840_v7, 7 }
 0x1f3   : > { %1725 = vmatpush2.bf16.msra.mxu1 %v939_v12  ;;  %1683 = vmatprep.subr.bf16.mxu0 %v872_v14  ;;  %v851_v12 = vunpack.c.h.s8.bf16 %v447_v41  ;;  %v915_v14 = vunpack.c.h.s8.bf16 %v479_v4  ;;  %v1358_v36 = vadd.f32 %v1357_v11, %v1315_v21 }
 0x1f4   : > { %1726 = vmatprep.subr.bf16.mxu1 %v936_v15  ;;  %v1400_v15 = vpop.f32.mrf.mxu1  ;;  %v1359_v24 = vpop.f32.mrf.mxu0  ;;  %v2993_v58 = vsub.s32 1, %v2971_v5 }
 0x1f6   : > { %1684 = vmatpush2.bf16.msra.mxu0 %v871_v19  ;;  %v508_v19 = vld [vmem:[%s2586_s29 + $0x678] sm:$0xff]  ;;  %v1402_v13 = vpop.f32.mrf.mxu1  ;;  %v1361_v48 = vpop.f32.mrf.mxu0 }
 0x1f7   : > { %1727 = vmatpush2.bf16.msra.mxu1 %v935_v20  ;;  %1685 = vmatprep.subr.bf16.mxu0 %v868_v22  ;;  %v540_v20 = vld [vmem:[%s2586_s29 + $0x778] sm:$0xff]  ;;  %v1313_v22 = vadd.f32 %v2946_v27, %v1270_v9  ;;  %v2982_v27 = vsub.s32 0, %v2971_v5  ;;  %v968_v30 = vunpack.c.l.s8.bf16 %v508_v19 }
 0x1f8   : > { %1728 = vmatprep.subr.bf16.mxu1 %v932_v23  ;;  %v1274_v23 = vadd.f32 %v1273_v28, %v1231_v32  ;;  %v1032_v28 = vunpack.c.l.s8.bf16 %v540_v20 }
 0x1fa   : > { %1686 = vmatpush2.bf16.msra.mxu0 %v867_v37  ;;  %v972_v37 = vunpack.c.h.s8.bf16 %v508_v19  ;;  %v1317_v53 = vadd.f32 %v2954_v35, %v1274_v23 }
 0x1fb   : > { %1729 = vmatpush2.bf16.msra.mxu1 %v931_v39  ;;  %1687 = vmatprep.subr.bf16.mxu0 %v864_v46  ;;  %v1036_v39 = vunpack.c.h.s8.bf16 %v540_v20  ;;  %v2975_v46 = vld [vmem:[%s2586_s29 + $0x670] sm:$0xff] }
 0x1fc   : > { %1730 = vmatprep.subr.bf16.mxu1 %v928_v50  ;;  %v1356_v50 = vadd.f32 %v1355_v33, %v1313_v22  ;;  %v971_v49 = vunpack.c.h.s8.bf16 %v2975_v46  ;;  %v1401_v33 = vadd.f32 %v1400_v15, %v1358_v36 }
 0x1fe   : > { %1688 = vmatpush2.bf16.msra.mxu0 %v863_v54  ;;  %v2988_v54 = vld [vmem:[%s2985_s21 + $0x3] ss:$4 sm:$0xf]  ;;  %v1399_v35 = vadd.f32 %v1398_v1, %v1356_v50  ;;  %v967_v1 = vunpack.c.l.s8.bf16 %v2975_v46 }
 0x1ff   : > { %1731 = vmatpush2.bf16.msra.mxu1 %v927_v55  ;;  %1689 = vmatprep.subr.bf16.mxu0 %v860_v56  ;;  %v1035_v55 = vunpack.c.h.s8.bf16 %v2978_v18  ;;  %v1319_v56 = vadd.f32 %v1318_v61, %v1276_v10  ;;  %v1843_v61 = vrot.slane %v2988_v54, %v2982_v27  ;;  %v500_v46 = vld [vmem:[%s2586_s29 + $0x638] sm:$0xff] }
 0x200   : > { %1732 = vmatprep.subr.bf16.mxu1 %v924_v57  ;;  %v1404_v57 = vpop.f32.mrf.mxu1 }
 0x201   : > { %v1362_v31 = vadd.f32 %v1361_v48, %v1319_v56  ;;  %v956_v56 = vunpack.c.h.s8.bf16 %v500_v46 }
 0x202   : > { %1690 = vmatpush2.bf16.msra.mxu0 %v859_v51  ;;  %v1360_v51 = vadd.f32 %v1359_v24, %v1317_v53 }
 0x203   : > { %1733 = vmatpush2.bf16.msra.mxu1 %v923_v52  ;;  %1691 = vmatprep.subr.bf16.mxu0 %v856_v44  ;;  %v2996_v52 = vld [vmem:[%s2985_s21] ss:$4 sm:$0xf]  ;;  %v1405_v15 = vadd.f32 %v1404_v57, %v1362_v31 }
 0x204   : > { %1734 = vmatprep.subr.bf16.mxu1 %v920_v45  ;;  %v2999_v44 = vld [vmem:[%s2586_s29 + $0x658] sm:$0xff]  ;;  %v1873_v41 = vrot.slane %v2996_v52, %v2982_v27  ;;  %v1403_v9 = vadd.f32 %v1402_v13, %v1360_v51 }
 0x205   : > { %v3002_v45 = vld [vmem:[%s2586_s29 + $0x758] sm:$0xff]  ;;  %v964_v6 = vunpack.c.h.s8.bf16 %v2999_v44 }
 0x206   : > { %1692 = vmatpush2.bf16.msra.mxu0 %v855_v62  ;;  %v1028_v7 = vunpack.c.h.s8.bf16 %v3002_v45 }
 0x207   : > { %1735 = vmatpush2.bf16.msra.mxu1 %v919_v0  ;;  %1693 = vmatprep.subr.bf16.mxu0 %v852_v2  ;;  %v3009_v0 = vld [vmem:[%s2985_s21 + $0x1] ss:$4 sm:$0xf]  ;;  %v1031_v2 = vunpack.c.l.s8.bf16 %v2978_v18 }
 0x208   : > { %1736 = vmatprep.subr.bf16.mxu1 %v916_v3  ;;  %v3014_v3 = vld [vmem:[%s2586_s29 + $0x650] sm:$0xff]  ;;  %v1908_v23 = vrot.slane %v3009_v0, %v2993_v58  ;;  %v532_v18 = vld [vmem:[%s2586_s29 + $0x738] sm:$0xff] }
 0x209   : > { %v963_v19 = vunpack.c.h.s8.bf16 %v3014_v3  ;;  %v1020_v57 = vunpack.c.h.s8.bf16 %v532_v18 }
 0x20a   : > { %1694 = vmatpush2.bf16.msra.mxu0 %v851_v12  ;;  %v3024_v12 = vld [vmem:[%s2985_s21 + $0x2] ss:$4 sm:$0xf] }
 0x20b   : > { %1737 = vmatpush2.bf16.msra.mxu1 %v915_v14  ;;  %1695 = vmatprep.subr.bf16.mxu0 %v848_v16  ;;  %v1904_v16 = vrot.slane %v3009_v0, %v2982_v27  ;;  %v1939_v21 = vrot.slane %v3024_v12, %v2993_v58 }
 0x20c   : > { %1738 = vmatprep.subr.bf16.mxu1 %v912_v17  ;;  %v1877_v17 = vrot.slane %v2996_v52, %v2993_v58 }
 0x20e   : > { %1696 = vmatpush2.bf16.msra.mxu0 %v847_v25  ;;  %v960_v25 = vunpack.c.l.s8.bf16 %v2999_v44 }
 0x20f   : > { %1739 = vmatpush2.bf16.msra.mxu1 %v911_v26  ;;  %1751 = vmatprep.subr.bf16.mxu0 %v972_v37  ;;  %v1024_v26 = vunpack.c.l.s8.bf16 %v3002_v45 }
 0x210   : > { %1794 = vmatprep.subr.bf16.mxu1 %v1036_v39 }
 0x211   : > { %v1441_v59 = vpop.f32.mrf.mxu0  ;;  %1698 = vmatmul.mubr.bf16.vlgmr.msra.gmra.mxu0 %v2770_v29 }
 0x212   : > { %v1484_v60 = vpop.f32.mrf.mxu1  ;;  %1741 = vmatmul.mubr.bf16.vlgmr.msra.gmra.mxu1 %v2774_v34  ;;  %v1442_v62 = vadd.f32 %v1441_v59, %v1399_v35  ;;  %1752 = vmatpush1.bf16.msra.mxu0 %v971_v49  ;;  %v1847_v34 = vrot.slane %v2988_v54, %v2993_v58  ;;  %v531_v58 = vld [vmem:[%s2586_s29 + $0x730] sm:$0xff] }
 0x213   : > { %1795 = vmatpush1.bf16.msra.mxu1 %v1035_v55  ;;  %v1443_v29 = vpop.f32.mrf.mxu0  ;;  %1753 = vmatprep.subr.bf16.mxu0 %v968_v30  ;;  %v1023_v55 = vunpack.c.l.s8.bf16 %v535_v8  ;;  %v499_v30 = vld [vmem:[%s2586_s29 + $0x630] sm:$0xff] }
 0x214   : > { %v1486_v4 = vpop.f32.mrf.mxu1  ;;  %1796 = vmatprep.subr.bf16.mxu1 %v1032_v28  ;;  %v1485_v11 = vadd.f32 %v1484_v60, %v1442_v62  ;;  %v1444_v14 = vadd.f32 %v1443_v29, %v1401_v33  ;;  %1783 = vmatprep.mubr.bf16.mxu0 %v2786_v42  ;;  %v1027_v42 = vunpack.c.h.s8.bf16 %v535_v8  ;;  %v955_v60 = vunpack.c.h.s8.bf16 %v499_v30 }
 0x215   : > { %1826 = vmatprep.mubr.bf16.mxu1 %v2790_v43  ;;  %v1445_v32 = vpop.f32.mrf.mxu0  ;;  %v1935_v43 = vrot.slane %v3024_v12, %v2982_v27  ;;  %v959_v27 = vunpack.c.l.s8.bf16 %v3014_v3  ;;  %v952_v33 = vunpack.c.l.s8.bf16 %v500_v46  ;;  %v496_v3 = vld [vmem:[%s2586_s29 + $0x618] sm:$0xff]  ;;  %v519_v46 = vld [vmem:[%s2586_s29 + $0x6d0] sm:$0xff] }
 0x216   : > { %v1488_v63 = vpop.f32.mrf.mxu1  ;;  %v1860_v20 = vmul.f32 %v1843_v61, %v1485_v11  ;;  %v1487_v38 = vadd.f32 %v1486_v4, %v1444_v14  ;;  %v1446_v22 = vadd.f32 %v1445_v32, %v1403_v9  ;;  %1754 = vmatpush1.bf16.msra.mxu0 %v967_v1  ;;  %v951_v4 = vunpack.c.l.s8.bf16 %v499_v30  ;;  %v527_v9 = vld [vmem:[%s2586_s29 + $0x710] sm:$0xff]  ;;  %v556_v32 = vld [vmem:[%s2586_s29 + $0x7f8] sm:$0xff] }
 0x217   : > { %1797 = vmatpush1.bf16.msra.mxu1 %v1031_v2  ;;  %v1447_v24 = vpop.f32.mrf.mxu0  ;;  %1755 = vmatprep.subr.bf16.mxu0 %v964_v6  ;;  %v1016_v2 = vunpack.c.l.s8.bf16 %v532_v18  ;;  %v948_v6 = vunpack.c.h.s8.bf16 %v496_v3  ;;  %v1011_v14 = vunpack.c.h.s8.bf16 %v527_v9  ;;  %v515_v30 = vld [vmem:[%s2586_s29 + $0x6b0] sm:$0xff] }
 0x218   : > { %1798 = vmatprep.subr.bf16.mxu1 %v1028_v7  ;;  %v1890_v10 = vadd.f32 %v1873_v41, %v1860_v20  ;;  %v1861_v13 = vmul.f32 %v1847_v34, %v1487_v38  ;;  %v1489_v37 = vadd.f32 %v1488_v63, %v1446_v22  ;;  %v1448_v39 = vadd.f32 %v1447_v24, %v1405_v15  ;;  %v1490_v50 = vpop.f32.mrf.mxu1  ;;  %v495_v7 = vld [vmem:[%s2586_s29 + $0x610] sm:$0xff] }
 0x219   : > { %v947_v11 = vunpack.c.h.s8.bf16 %v495_v7  ;;  %v944_v15 = vunpack.c.l.s8.bf16 %v496_v3  ;;  %v943_v63 = vunpack.c.l.s8.bf16 %v495_v7  ;;  %v523_v38 = vld [vmem:[%s2586_s29 + $0x6f0] sm:$0xff]  ;;  %v1068_v22 = vunpack.c.h.s8.bf16 %v556_v32 }
 0x21a   : > { %v1921_v53 = vmul.f32 %v1904_v16, %v1890_v10  ;;  %v1891_v36 = vadd.f32 %v1877_v17, %v1861_v13  ;;  %v1864_v48 = vmul.f32 %v1843_v61, %v1489_v37  ;;  %v1491_v49 = vadd.f32 %v1490_v50, %v1448_v39  ;;  %1756 = vmatpush1.bf16.msra.mxu0 %v963_v19  ;;  %v552_v10 = vld [vmem:[%s2586_s29 + $0x7d8] sm:$0xff] }
 0x21b   : > { %1799 = vmatpush1.bf16.msra.mxu1 %v1027_v42  ;;  %1757 = vmatprep.subr.bf16.mxu0 %v960_v25  ;;  %v1019_v61 = vunpack.c.h.s8.bf16 %v531_v58  ;;  %v1007_v19 = vunpack.c.l.s8.bf16 %v527_v9  ;;  %v555_v42 = vld [vmem:[%s2586_s29 + $0x7f0] sm:$0xff]  ;;  %v1064_v25 = vunpack.c.l.s8.bf16 %v556_v32  ;;  %v999_v13 = vunpack.c.l.s8.bf16 %v523_v38 }
 0x21c   : > { %v1952_v28 = vadd.f32 %v1935_v43, %v1921_v53  ;;  %v1922_v35 = vmul.f32 %v1908_v23, %v1891_v36  ;;  %v1894_v51 = vadd.f32 %v1873_v41, %v1864_v48  ;;  %v1865_v44 = vmul.f32 %v1847_v34, %v1491_v49  ;;  %1800 = vmatprep.subr.bf16.mxu1 %v1024_v26  ;;  %v528_v41 = vld [vmem:[%s2586_s29 + $0x718] sm:$0xff] }
 0x21d   : > { %v1015_v34 = vunpack.c.l.s8.bf16 %v531_v58  ;;  %v1012_v8 = vunpack.c.h.s8.bf16 %v528_v41  ;;  %v520_v26 = vld [vmem:[%s2586_s29 + $0x6d8] sm:$0xff]  ;;  %v1063_v37 = vunpack.c.l.s8.bf16 %v555_v42  ;;  %v1060_v18 = vunpack.c.h.s8.bf16 %v552_v10 }
 0x21e   : > { %1960 = vst [vmem:[%s3047_s28] sm:$0xff] %v1952_v28  ;;  %v1953_v45 = vadd.f32 %v1939_v21, %v1922_v35  ;;  %v1925_v31 = vmul.f32 %v1904_v16, %v1894_v51  ;;  %v1895_v59 = vadd.f32 %v1877_v17, %v1865_v44  ;;  %1758 = vmatpush1.bf16.msra.mxu0 %v959_v27  ;;  %v1008_v16 = vunpack.c.l.s8.bf16 %v528_v41  ;;  %v524_v17 = vld [vmem:[%s2586_s29 + $0x6f8] sm:$0xff]  ;;  %v547_v35 = vld [vmem:[%s2586_s29 + $0x7b0] sm:$0xff] }
 0x21f   : > { %1801 = vmatpush1.bf16.msra.mxu1 %v1023_v55  ;;  %1759 = vmatprep.subr.bf16.mxu0 %v956_v56  ;;  %v1004_v20 = vunpack.c.h.s8.bf16 %v524_v17  ;;  %v1000_v24 = vunpack.c.l.s8.bf16 %v524_v17  ;;  %v996_v39 = vunpack.c.h.s8.bf16 %v520_v26  ;;  %v995_v50 = vunpack.c.h.s8.bf16 %v519_v46  ;;  %v516_v48 = vld [vmem:[%s2586_s29 + $0x6b8] sm:$0xff] }
 0x220   : > { %1961 = vst [vmem:[%s3047_s28 + $0x8] sm:$0xff] %v1953_v45  ;;  %v1956_v62 = vadd.f32 %v1935_v43, %v1925_v31  ;;  %v1926_v1 = vmul.f32 %v1908_v23, %v1895_v59  ;;  %1802 = vmatprep.subr.bf16.mxu1 %v1020_v57  ;;  %v1003_v43 = vunpack.c.h.s8.bf16 %v523_v38  ;;  %v1067_v23 = vunpack.c.h.s8.bf16 %v555_v42  ;;  %v548_v49 = vld [vmem:[%s2586_s29 + $0x7b8] sm:$0xff] }
 0x221   : > { %v992_v53 = vunpack.c.l.s8.bf16 %v520_v26  ;;  %v1056_v36 = vunpack.c.l.s8.bf16 %v552_v10  ;;  %v991_v55 = vunpack.c.l.s8.bf16 %v519_v46  ;;  %v988_v57 = vunpack.c.h.s8.bf16 %v516_v48  ;;  %v512_v31 = vld [vmem:[%s2586_s29 + $0x698] sm:$0xff] }
 0x222   : > { %1964 = vst [vmem:[%s3047_s28 + $0x20] sm:$0xff] %v1956_v62  ;;  %v1957_v29 = vadd.f32 %v1939_v21, %v1926_v1  ;;  %1760 = vmatpush1.bf16.msra.mxu0 %v955_v60  ;;  %v551_v21 = vld [vmem:[%s2586_s29 + $0x7d0] sm:$0xff]  ;;  %v1052_v28 = vunpack.c.h.s8.bf16 %v548_v49  ;;  %v987_v51 = vunpack.c.h.s8.bf16 %v515_v30  ;;  %v1051_v44 = vunpack.c.h.s8.bf16 %v547_v35  ;;  %v544_v59 = vld [vmem:[%s2586_s29 + $0x798] sm:$0xff] }
 0x223   : > { %1803 = vmatpush1.bf16.msra.mxu1 %v1019_v61  ;;  %1761 = vmatprep.subr.bf16.mxu0 %v952_v33  ;;  %v1059_v27 = vunpack.c.h.s8.bf16 %v551_v21  ;;  %v1055_v56 = vunpack.c.l.s8.bf16 %v551_v21  ;;  %v984_v58 = vunpack.c.l.s8.bf16 %v516_v48  ;;  %v1048_v45 = vunpack.c.l.s8.bf16 %v548_v49  ;;  %v511_v62 = vld [vmem:[%s2586_s29 + $0x690] sm:$0xff] }
 0x224   : > { %1965 = vst [vmem:[%s3047_s28 + $0x28] sm:$0xff] %v1957_v29  ;;  %1804 = vmatprep.subr.bf16.mxu1 %v1016_v2  ;;  %v983_v60 = vunpack.c.l.s8.bf16 %v515_v30  ;;  %v1047_v61 = vunpack.c.l.s8.bf16 %v547_v35  ;;  %v980_v33 = vunpack.c.h.s8.bf16 %v512_v31  ;;  %v1044_v1 = vunpack.c.h.s8.bf16 %v544_v59  ;;  %v543_v2 = vld [vmem:[%s2586_s29 + $0x790] sm:$0xff] }
 0x225   : > { %v979_v3 = vunpack.c.h.s8.bf16 %v511_v62  ;;  %v1043_v41 = vunpack.c.h.s8.bf16 %v543_v2  ;;  %v976_v29 = vunpack.c.l.s8.bf16 %v512_v31 }
 0x226   : > { %1762 = vmatpush1.bf16.msra.mxu0 %v951_v4  ;;  %v1040_v4 = vunpack.c.l.s8.bf16 %v544_v59 }
 0x227   : > { %1805 = vmatpush1.bf16.msra.mxu1 %v1015_v34  ;;  %1763 = vmatprep.subr.bf16.mxu0 %v948_v6  ;;  %v975_v34 = vunpack.c.l.s8.bf16 %v511_v62  ;;  %v1039_v6 = vunpack.c.l.s8.bf16 %v543_v2 }
 0x228   : > { %1806 = vmatprep.subr.bf16.mxu1 %v1012_v8 }
 0x22a   : > { %1764 = vmatpush1.bf16.msra.mxu0 %v947_v11 }
 0x22b   : > { %1807 = vmatpush1.bf16.msra.mxu1 %v1011_v14  ;;  %1765 = vmatprep.subr.bf16.mxu0 %v944_v15 }
 0x22c   : > { %1808 = vmatprep.subr.bf16.mxu1 %v1008_v16 }
 0x22e   : > { %1766 = vmatpush1.bf16.msra.mxu0 %v943_v63 }
 0x22f   : > { %1809 = vmatpush1.bf16.msra.mxu1 %v1007_v19  ;;  %1767 = vmatprep.subr.bf16.mxu0 %v1004_v20 }
 0x230   : > { %1810 = vmatprep.subr.bf16.mxu1 %v1068_v22 }
 0x232   : > { %1768 = vmatpush2.bf16.msra.mxu0 %v1003_v43 }
 0x233   : > { %1811 = vmatpush2.bf16.msra.mxu1 %v1067_v23  ;;  %1769 = vmatprep.subr.bf16.mxu0 %v1000_v24 }
 0x234   : > { %1812 = vmatprep.subr.bf16.mxu1 %v1064_v25 }
 0x236   : > { %1770 = vmatpush2.bf16.msra.mxu0 %v999_v13 }
 0x237   : > { %1813 = vmatpush2.bf16.msra.mxu1 %v1063_v37  ;;  %1771 = vmatprep.subr.bf16.mxu0 %v996_v39 }
 0x238   : > { %1814 = vmatprep.subr.bf16.mxu1 %v1060_v18 }
 0x23a   : > { %1772 = vmatpush2.bf16.msra.mxu0 %v995_v50 }
 0x23b   : > { %1815 = vmatpush2.bf16.msra.mxu1 %v1059_v27  ;;  %1773 = vmatprep.subr.bf16.mxu0 %v992_v53 }
 0x23c   : > { %1816 = vmatprep.subr.bf16.mxu1 %v1056_v36 }
 0x23e   : > { %1774 = vmatpush2.bf16.msra.mxu0 %v991_v55  ;;  %v1850_v55 = vsub.s32 2, %v2971_v5 }
 0x23f   : > { %1817 = vmatpush2.bf16.msra.mxu1 %v1055_v56  ;;  %1775 = vmatprep.subr.bf16.mxu0 %v988_v57 }
 0x240   : > { %1818 = vmatprep.subr.bf16.mxu1 %v1052_v28 }
 0x242   : > { %1776 = vmatpush2.bf16.msra.mxu0 %v987_v51  ;;  %v1854_v51 = vsub.s32 3, %v2971_v5 }
 0x243   : > { %1819 = vmatpush2.bf16.msra.mxu1 %v1051_v44  ;;  %1777 = vmatprep.subr.bf16.mxu0 %v984_v58 }
 0x244   : > { %1820 = vmatprep.subr.bf16.mxu1 %v1048_v45  ;;  %v1885_v5 = vrot.slane %v2996_v52, %v1854_v51 }
 0x246   : > { %1778 = vmatpush2.bf16.msra.mxu0 %v983_v60  ;;  %v1851_v60 = vrot.slane %v2988_v54, %v1850_v55 }
 0x247   : > { %1821 = vmatpush2.bf16.msra.mxu1 %v1047_v61  ;;  %1779 = vmatprep.subr.bf16.mxu0 %v980_v33  ;;  %v1881_v61 = vrot.slane %v2996_v52, %v1850_v55  ;;  %v1947_v52 = vrot.slane %v3024_v12, %v1854_v51 }
 0x248   : > { %1822 = vmatprep.subr.bf16.mxu1 %v1044_v1 }
 0x24a   : > { %1780 = vmatpush2.bf16.msra.mxu0 %v979_v3 }
 0x24b   : > { %1823 = vmatpush2.bf16.msra.mxu1 %v1043_v41  ;;  %1781 = vmatprep.subr.bf16.mxu0 %v976_v29  ;;  %v1855_v41 = vrot.slane %v2988_v54, %v1854_v51  ;;  %v1912_v29 = vrot.slane %v3009_v0, %v1850_v55 }
 0x24c   : > { %1824 = vmatprep.subr.bf16.mxu1 %v1040_v4 }
 0x24e   : > { %1782 = vmatpush2.bf16.msra.mxu0 %v975_v34 }
 0x24f   : > { %1825 = vmatpush2.bf16.msra.mxu1 %v1039_v6 }
 0x251   : > { %1784 = vmatmul.mubr.bf16.vlgmr.msra.gmra.mxu0 %v2828_v40  ;;  %v1527_v7 = vpop.f32.mrf.mxu0 }
 0x252   : > { %1827 = vmatmul.mubr.bf16.vlgmr.msra.gmra.mxu1 %v2832_v47  ;;  %v1570_v8 = vpop.f32.mrf.mxu1 }
 0x253   : > { %v1529_v9 = vpop.f32.mrf.mxu0  ;;  %v1571_v40 = vadd.f32 %v1570_v8, %v1527_v7 }
 0x254   : > { %v1572_v11 = vpop.f32.mrf.mxu1 }
 0x255   : > { %v1531_v14 = vpop.f32.mrf.mxu0  ;;  %v1573_v47 = vadd.f32 %v1572_v11, %v1529_v9  ;;  %v1943_v11 = vrot.slane %v3024_v12, %v1850_v55 }
 0x256   : > { %v1574_v15 = vpop.f32.mrf.mxu1 }
 0x257   : > { %v1533_v16 = vpop.f32.mrf.mxu0  ;;  %v1575_v10 = vadd.f32 %v1574_v15, %v1531_v14  ;;  %v1916_v14 = vrot.slane %v3009_v0, %v1854_v51 }
 0x258   : > { %v1576_v17 = vpop.f32.mrf.mxu1 }
 0x259   : > { %v1577_v39 = vadd.f32 %v1576_v17, %v1533_v16 }
 0x291   : > { %v1613_v32 = vpop.f32.mrf.mxu0 }
 0x292   : > { %v1656_v63 = vpop.f32.mrf.mxu1  ;;  %v1614_v25 = vadd.f32 %v1613_v32, %v1571_v40 }
 0x293   : > { %v1615_v19 = vpop.f32.mrf.mxu0 }
 0x294   : > { %v1658_v20 = vpop.f32.mrf.mxu1  ;;  %v1616_v13 = vadd.f32 %v1615_v19, %v1573_v47  ;;  %v1657_v46 = vadd.f32 %v1656_v63, %v1614_v25 }
 0x295   : > { %v1617_v38 = vpop.f32.mrf.mxu0 }
 0x296   : > { %v1660_v22 = vpop.f32.mrf.mxu1  ;;  %v1618_v18 = vadd.f32 %v1617_v38, %v1575_v10  ;;  %v1659_v50 = vadd.f32 %v1658_v20, %v1616_v13 }
 0x297   : > { %v1619_v42 = vpop.f32.mrf.mxu0 }
 0x298   : > { %v1662_v43 = vpop.f32.mrf.mxu1  ;;  %v1620_v27 = vadd.f32 %v1619_v42, %v1577_v39  ;;  %v1661_v48 = vadd.f32 %v1660_v22, %v1618_v18 }
 0x29a   : > { %v1663_v57 = vadd.f32 %v1662_v43, %v1620_v27 }
 0x2d1   : > { %v1699_v23 = vpop.f32.mrf.mxu0 }
 0x2d2   : > { %v1742_v24 = vpop.f32.mrf.mxu1  ;;  %v1700_v53 = vadd.f32 %v1699_v23, %v1657_v46 }
 0x2d3   : > { %v1701_v26 = vpop.f32.mrf.mxu0 }
 0x2d4   : > { %v1744_v37 = vpop.f32.mrf.mxu1  ;;  %v1702_v49 = vadd.f32 %v1701_v26, %v1659_v50  ;;  %v1743_v30 = vadd.f32 %v1742_v24, %v1700_v53 }
 0x2d5   : > { %v1703_v21 = vpop.f32.mrf.mxu0 }
 0x2d6   : > { %v1746_v36 = vpop.f32.mrf.mxu1  ;;  %v1704_v28 = vadd.f32 %v1703_v21, %v1661_v48  ;;  %v1745_v58 = vadd.f32 %v1744_v37, %v1702_v49 }
 0x2d7   : > { %v1705_v56 = vpop.f32.mrf.mxu0 }
 0x2d8   : > { %v1748_v35 = vpop.f32.mrf.mxu1  ;;  %v1706_v45 = vadd.f32 %v1705_v56, %v1663_v57  ;;  %v1747_v62 = vadd.f32 %v1746_v36, %v1704_v28 }
 0x2da   : > { %v1749_v34 = vadd.f32 %v1748_v35, %v1706_v45 }
 0x311   : > { %v1785_v44 = vpop.f32.mrf.mxu0 }
 0x312   : > { %v1786_v31 = vadd.f32 %v1785_v44, %v1743_v30  ;;  %v1828_v59 = vpop.f32.mrf.mxu1 }
 0x313   : > { %v1787_v33 = vpop.f32.mrf.mxu0 }
 0x314   : > { %v1829_v1 = vadd.f32 %v1828_v59, %v1786_v31  ;;  %v1788_v2 = vadd.f32 %v1787_v33, %v1745_v58  ;;  %v1830_v3 = vpop.f32.mrf.mxu1 }
 0x315   : > { %v1789_v4 = vpop.f32.mrf.mxu0 }
 0x316   : > { %v1862_v6 = vmul.f32 %v1851_v60, %v1829_v1  ;;  %v1831_v7 = vadd.f32 %v1830_v3, %v1788_v2  ;;  %v1790_v8 = vadd.f32 %v1789_v4, %v1747_v62  ;;  %v1832_v9 = vpop.f32.mrf.mxu1 }
 0x317   : > { %v1791_v15 = vpop.f32.mrf.mxu0 }
 0x318   : > { %v1892_v16 = vadd.f32 %v1881_v61, %v1862_v6  ;;  %v1863_v17 = vmul.f32 %v1855_v41, %v1831_v7  ;;  %v1833_v54 = vadd.f32 %v1832_v9, %v1790_v8  ;;  %v1792_v32 = vadd.f32 %v1791_v15, %v1749_v34  ;;  %v1834_v63 = vpop.f32.mrf.mxu1 }
 0x31a   : > { %v1923_v19 = vmul.f32 %v1912_v29, %v1892_v16  ;;  %v1893_v20 = vadd.f32 %v1885_v5, %v1863_v17  ;;  %v1866_v38 = vmul.f32 %v1851_v60, %v1833_v54  ;;  %v1835_v22 = vadd.f32 %v1834_v63, %v1792_v32 }
 0x31c   : > { %v1954_v42 = vadd.f32 %v1943_v11, %v1923_v19  ;;  %v1924_v43 = vmul.f32 %v1916_v14, %v1893_v20  ;;  %v1896_v0 = vadd.f32 %v1881_v61, %v1866_v38  ;;  %v1867_v23 = vmul.f32 %v1855_v41, %v1835_v22 }
 0x31e   : > { %1962 = vst [vmem:[%s3047_s28 + $0x10] sm:$0xff] %v1954_v42  ;;  %v1955_v40 = vadd.f32 %v1947_v52, %v1924_v43  ;;  %v1927_v24 = vmul.f32 %v1912_v29, %v1896_v0  ;;  %v1897_v47 = vadd.f32 %v1885_v5, %v1867_v23 }
 0x320   : > { %1963 = vst [vmem:[%s3047_s28 + $0x18] sm:$0xff] %v1955_v40  ;;  %v1958_v12 = vadd.f32 %v1943_v11, %v1927_v24  ;;  %v1928_v25 = vmul.f32 %v1916_v14, %v1897_v47 }
 0x322   : > { %1966 = vst [vmem:[%s3047_s28 + $0x30] sm:$0xff] %v1958_v12  ;;  %v1959_v26 = vadd.f32 %v1947_v52, %v1928_v25 }
 0x324   : > { %1967 = vst [vmem:[%s3047_s28 + $0x38] sm:$0xff] %v1959_v26 }
 0x325   : > { %2335 = shalt.err (!%p2332_p3)
}
 0x326   : > { %s2336_s10 = scalar_lea.hbm %s3094_s7, 1024  ;;  %s2340_s6 = scalar_lea.hbm %s3147_s3, 2048 }
 0x327   : > { %p2337_p6 = scmp.ne.s32.totalorder %s3094_s7, %s2336_s10  ;;  %p2341_p12 = scmp.lt.s32.totalorder %s3094_s7, %s3147_s3 }
 0x328   : > { %p2342_p13 = scmp.lt.s32.totalorder %s2340_s6, %s2336_s10 }
 0x329   : > { %p2338_p9 = pnand %p2337_p6, %p3158_p5 }
 0x32a   : > { %p2343_p11 = por %p2342_p13, %p2341_p12 }
 0x32b   : > { %p2339_p8 = pneg %p2338_p9 }
 0x32d   : > { %p2344_p7 = pnand %p2343_p11, %p2339_p8 }
 0x32f   : > { %2347 = shalt.err (!%p2344_p7)
}
 0x330   : > { %s2416_s28 = smov 512   ;;  %s2417_s22 = smov 1024  }
 0x331   : > { %s2418_s4 = smov 32  }
 0x332   : > { %2163 = dma.vmem_to_hbm [thread:$0]  (%p3158_p5), %s3088_s9, 1024, %s3094_s7, %s1969_s19, %s2416_s28, %s2417_s22, %s2418_s4  }
 0x333 PF: > { %s2000_s8 = sand.u32 1, %s2386_s12   ;;  %p3159_p10 = scmp.ne.s32.totalorder %s3154_s27, 0 }
 0x334   : > { %p3160_p2 = scmp.ge.s32.totalorder %s2406_s17, 2  ;;  %s2001_s20 = scalar_lea.sflag [#allocation4], %s2000_s8 }
 0x336   : > { %p2177_p1 = pnand %p3160_p2, %p3159_p10 }
 0x338   : > { %p2178_p0 = pneg %p2177_p1 }
 0x33a   : > { %2381 = dma.done.wait (%p2178_p0), %s2001_s20, 1024  }
 0x33b   : > { %2383 = vsyncadd (%p2178_p0), %s2001_s20, 4294966272  ;;  %s20_s17 = sadd.s32 1, %s2406_s17   ;;  %s3161_s12 = smov %s2390_s13 }
 0x33c   : > { %p17_p4 = scmp.ge.s32.totalorder %s20_s17, 4   ;;  %s3162_s13 = smov %s2394_s14 }
 0x33d   : > { %s3163_s14 = smov %s2490_s24  ;;  %s3164_s15 = smov %s2402_s16 }
 0x33e   : > { %s3165_s16 = smov %s3167_s18  ;;  %19 = sbr.rel (!%p17_p4) target bundleno = 7 (0x7), region = 97 }
 0x343   :  { %2006 = vsyncpa [#allocation3], 1 }
 0x344   :  { %2008 = vsyncpa [#allocation3 + $0x1], 1 }
 0x345   :  { %2009 = vsyncpa [#allocation6], 1 }
 0x346   :  { %2011 = vsyncpa [#allocation6 + $0x1], 1 }
 0x347   :  { %2012 = vsyncpa [#allocation4], 1 }
 0x348   :  { %2014 = vsyncpa [#allocation4 + $0x1], 1 }

</bundles_post_ra>
